<compile_context>
chip_gen: v7x
topology: tpu7x:2x2x1
jax: 0.10.0
libtpu: 0.0.40
codegen_flags: <defaults>
</compile_context>

<pallas_src>
from functools import partial

import jax
import jax.numpy as jnp
from jax.experimental import pallas as pl
from jax.experimental.pallas import tpu as pltpu

INPUT_DIM = 512   # fixed by out_layer1 = Linear(512, 256)
HEAD_OUT = 2      # true output width (and the full last dim of the output array)
HEAD_PAD = 128    # lane-dense padded width for the in-VMEM folded head weight
MAX_TB = 2048     # batch-tile cap (review opt #1)


def _round_up(n, m):
    return (n + m - 1) // m * m


def _attention_kernel(x_ref,
                      w_wt_ref, w_b_ref,
                      v_wt_ref,
                      h_wt_ref, h_b_ref,
                      o_ref):
    # x tile: [TB, 512], f32 or bf16 (no wrapper-side cast; see review v6e item).
    x = x_ref[...]
    x_f32 = x.astype(jnp.float32)     # elementwise attn * x stays in f32
    x_bf = x.astype(jnp.bfloat16)     # MXU operand

    # q = W(x)  -- bf16 MXU, f32 accumulate, f32 bias add
    q = jnp.dot(x_bf, w_wt_ref[...], preferred_element_type=jnp.float32) + w_b_ref[...]

    # scores = V(tanh(q))
    t = jnp.tanh(q).astype(jnp.bfloat16)
    s = jnp.dot(t, v_wt_ref[...], preferred_element_type=jnp.float32)

    # softmax over dim=1 (feature axis), numerically stable, f32 math.
    # Exact reciprocal (not pl.reciprocal(approx=True)) per correctness review.
    s = s - jnp.max(s, axis=1, keepdims=True)
    e = jnp.exp(s)
    attn = e / jnp.sum(e, axis=1, keepdims=True)

    # attended_x = attn_weights * x, then folded affine head (512 -> 128 padded),
    # storing only the 2 real output columns (lane-masked store, tiny HBM DMA).
    ax = (attn * x_f32).astype(jnp.bfloat16)
    out = jnp.dot(ax, h_wt_ref[...], preferred_element_type=jnp.float32) + h_b_ref[...]
    o_ref[...] = out[:, :HEAD_OUT].astype(o_ref.dtype)


def prepare_params(params):
    """One-time (init-time) preprocessing: fold the affine head, pad, cast to bf16."""
    # Fold L1 -> L2 -> L3 into a single affine map (f32), pad to 128 lanes.
    h_wt = params["L1_wt"] @ params["L2_wt"] @ params["L3_wt"]                                    # [512, 2]
    h_b = (params["L1_b"] @ params["L2_wt"] + params["L2_b"]) @ params["L3_wt"] + params["L3_b"]  # [1, 2]
    h_wt_p = jnp.zeros((INPUT_DIM, HEAD_PAD), jnp.float32).at[:, :HEAD_OUT].set(h_wt)
    h_b_p = jnp.zeros((1, HEAD_PAD), jnp.float32).at[:, :HEAD_OUT].set(h_b)
    return {
        "W_wt": params["W_wt"].astype(jnp.bfloat16),   # [512, 512] pre-transposed
        "W_b": params["W_b"],                          # [1, 512] f32
        "V_wt": params["V_wt"].astype(jnp.bfloat16),   # [512, 512] pre-transposed
        "H_wt": h_wt_p.astype(jnp.bfloat16),           # [512, 128] folded head weight
        "H_b": h_b_p,                                  # [1, 128] f32 folded head bias
    }


@partial(jax.jit, static_argnames=("tb",))
def attention_forward(x, prep, tb=None):
    """x: [B, 512] float32 or bfloat16. prep: output of prepare_params()."""
    B, D = x.shape
    assert D == INPUT_DIM

    if tb is None:
        # >= 2 grid steps (one per TensorCore on v7x; 2-deep pipeline on v5e/v6e),
        # tile capped at 2048 rows to amortize the ~0.35 us per-step overhead.
        tb = min(MAX_TB, _round_up(max(1, (B + 1) // 2), 8))
    tb = max(8, _round_up(tb, 8))
    bp = _round_up(B, tb)
    x_p = x if bp == B else jnp.pad(x, ((0, bp - B), (0, 0)))

    grid = (bp // tb,)
    x_bytes = x_p.size * x_p.dtype.itemsize

    cost = pl.CostEstimate(
        flops=2 * bp * INPUT_DIM * (INPUT_DIM + INPUT_DIM + HEAD_PAD),
        transcendentals=2 * bp * INPUT_DIM,          # tanh + exp
        bytes_accessed=(x_bytes + bp * HEAD_OUT * 4
                        + prep["W_wt"].size * 2 + prep["V_wt"].size * 2
                        + prep["H_wt"].size * 2
                        + prep["W_b"].size * 4 + prep["H_b"].size * 4),
    )

    out = pl.pallas_call(
        _attention_kernel,
        out_shape=jax.ShapeDtypeStruct((bp, HEAD_OUT), jnp.float32),
        grid=grid,
        in_specs=[
            pl.BlockSpec((tb, INPUT_DIM), lambda i: (i, 0)),          # x tile (pipelined)
            pl.BlockSpec((INPUT_DIM, INPUT_DIM), lambda i: (0, 0)),   # W^T   (VMEM-resident)
            pl.BlockSpec((1, INPUT_DIM), lambda i: (0, 0)),           # W bias
            pl.BlockSpec((INPUT_DIM, INPUT_DIM), lambda i: (0, 0)),   # V^T   (VMEM-resident)
            pl.BlockSpec((INPUT_DIM, HEAD_PAD), lambda i: (0, 0)),    # folded head weight
            pl.BlockSpec((1, HEAD_PAD), lambda i: (0, 0)),            # folded head bias
        ],
        # Last dim (2) equals the full array dim, so the (8,128) block rule holds;
        # HBM writeback is tb*2*4 bytes per tile instead of tb*128*4.
        out_specs=pl.BlockSpec((tb, HEAD_OUT), lambda i: (i, 0)),
        compiler_params=pltpu.CompilerParams(
            dimension_semantics=("parallel",),
            vmem_limit_bytes=32 * 1024 * 1024,
        ),
        cost_estimate=cost,
    )(x_p, prep["W_wt"], prep["W_b"], prep["V_wt"], prep["H_wt"], prep["H_b"])

    return out[:B, :]


def init_params(key):
    """Deterministic synthetic parameter init (PyTorch-Linear-like uniform)."""
    def linear(key, fan_in, fan_out, bias=True):
        kw, kb = jax.random.split(key)
        bound = 1.0 / (fan_in ** 0.5)
        # stored pre-transposed: [in, out]
        wt = jax.random.uniform(kw, (fan_in, fan_out), jnp.float32, -bound, bound)
        b = (jax.random.uniform(kb, (1, fan_out), jnp.float32, -bound, bound)
             if bias else None)
        return wt, b

    k = jax.random.split(key, 5)
    W_wt, W_b = linear(k[0], INPUT_DIM, INPUT_DIM, bias=True)
    V_wt, _ = linear(k[1], INPUT_DIM, INPUT_DIM, bias=False)
    L1_wt, L1_b = linear(k[2], 512, 256, bias=True)
    L2_wt, L2_b = linear(k[3], 256, 64, bias=True)
    L3_wt, L3_b = linear(k[4], 64, 2, bias=True)
    # self.fc = Linear(input_dim, 2) is unused in forward() and omitted here.
    return {
        "W_wt": W_wt, "W_b": W_b,
        "V_wt": V_wt,
        "L1_wt": L1_wt, "L1_b": L1_b,
        "L2_wt": L2_wt, "L2_b": L2_b,
        "L3_wt": L3_wt, "L3_b": L3_b,
    }


def reference_forward_f32(x, p):
    """Pure-JAX f32 reference matching the PyTorch forward exactly."""
    xf = x.astype(jnp.float32)
    q = xf @ p["W_wt"] + p["W_b"]
    s = jnp.tanh(q) @ p["V_wt"]
    attn = jax.nn.softmax(s, axis=1)
    ax = attn * xf
    h = ax @ p["L1_wt"] + p["L1_b"]
    h = h @ p["L2_wt"] + p["L2_b"]
    return h @ p["L3_wt"] + p["L3_b"]


def reference_forward_mixed(x, p):
    """Pure-JAX reference mirroring the kernel's bf16-MXU / f32-accumulate scheme."""
    bf = jnp.bfloat16
    xf = x.astype(jnp.float32)
    xb = x.astype(bf)
    h_wt = p["L1_wt"] @ p["L2_wt"] @ p["L3_wt"]
    h_b = (p["L1_b"] @ p["L2_wt"] + p["L2_b"]) @ p["L3_wt"] + p["L3_b"]
    q = jnp.dot(xb, p["W_wt"].astype(bf), preferred_element_type=jnp.float32) + p["W_b"]
    s = jnp.dot(jnp.tanh(q).astype(bf), p["V_wt"].astype(bf),
                preferred_element_type=jnp.float32)
    attn = jax.nn.softmax(s, axis=1)
    ax = (attn * xf).astype(bf)
    return jnp.dot(ax, h_wt.astype(bf), preferred_element_type=jnp.float32) + h_b


if __name__ == "__main__":
    key = jax.random.PRNGKey(0)
    kx, kx2, kx3, kp = jax.random.split(key, 4)
    params = init_params(kp)
    prep = prepare_params(params)   # fold/pad/cast ONCE at init (review opt #7)

    # Case 1: small batch, default tile (single step after rounding to 8 rows).
    B = 8
    x = jax.random.normal(kx, (B, INPUT_DIM), jnp.float32)
    out = jax.block_until_ready(attention_forward(x, prep))
    assert out.shape == (B, HEAD_OUT)
    ref_mx = reference_forward_mixed(x, params)
    ref_f32 = reference_forward_f32(x, params)
    assert jnp.allclose(out, ref_mx, atol=3e-3, rtol=3e-3), "mismatch vs mixed-precision reference"
    assert jnp.allclose(out, ref_f32, atol=3e-2, rtol=3e-2), "mismatch vs f32 reference"

    # Case 2: non-multiple batch + small explicit tile → multi-step grid + row padding.
    B2 = 40
    x2 = jax.random.normal(kx2, (B2, INPUT_DIM), jnp.float32)
    out2 = jax.block_until_ready(attention_forward(x2, prep, tb=16))
    assert out2.shape == (B2, HEAD_OUT)
    ref2 = reference_forward_mixed(x2, params)
    assert jnp.allclose(out2, ref2, atol=3e-3, rtol=3e-3), "mismatch vs mixed reference (gridded)"

    # Case 3: bf16 activations straight from an upstream producer (no wrapper cast):
    # exercises the halved-HBM x path (v6e) and the default >=2-step grid (v7x).
    B3 = 24
    x3 = jax.random.normal(kx3, (B3, INPUT_DIM), jnp.float32).astype(jnp.bfloat16)
    out3 = jax.block_until_ready(attention_forward(x3, prep))
    assert out3.shape == (B3, HEAD_OUT)
    ref3 = reference_forward_mixed(x3, params)
    assert jnp.allclose(out3, ref3, atol=3e-3, rtol=3e-3), "mismatch vs mixed reference (bf16 x)"

    print("KERNEL_OK")
</pallas_src>

<mosaic_0001>
module attributes {stable_mosaic.version = 11 : i64} {
  func.func @_attention_kernel(%arg0: i32, %arg1: memref<8x512xf32, #tpu.memory_space<vmem>>, %arg2: memref<512x512xbf16, #tpu.memory_space<vmem>>, %arg3: memref<1x512xf32, #tpu.memory_space<vmem>>, %arg4: memref<512x512xbf16, #tpu.memory_space<vmem>>, %arg5: memref<512x128xbf16, #tpu.memory_space<vmem>>, %arg6: memref<1x128xf32, #tpu.memory_space<vmem>>, %arg7: memref<8x2xf32, #tpu.memory_space<vmem>>) attributes {dimension_semantics = [#tpu.dimension_semantics<parallel>], iteration_bounds = array<i64: 1>, scalar_prefetch = 0 : i64, scratch_operands = 0 : i64, tpu.core_type = #tpu.core_type<tc>, window_params = [{transform_indices = @transform_0, window_bounds = array<i64: 8, 512>}, {pipeline_mode = #tpu.pipeline_mode<synchronous>, transform_indices = @transform_1, window_bounds = array<i64: 512, 512>}, {pipeline_mode = #tpu.pipeline_mode<synchronous>, transform_indices = @transform_2, window_bounds = array<i64: 1, 512>}, {pipeline_mode = #tpu.pipeline_mode<synchronous>, transform_indices = @transform_3, window_bounds = array<i64: 512, 512>}, {pipeline_mode = #tpu.pipeline_mode<synchronous>, transform_indices = @transform_4, window_bounds = array<i64: 512, 128>}, {pipeline_mode = #tpu.pipeline_mode<synchronous>, transform_indices = @transform_5, window_bounds = array<i64: 1, 128>}, {transform_indices = @transform_6, window_bounds = array<i64: 8, 2>}]} {
    %c0 = arith.constant 0 : index
    %c0_0 = arith.constant 0 : index
    %0 = vector.load %arg1[%c0, %c0_0] : memref<8x512xf32, #tpu.memory_space<vmem>>, vector<8x512xf32>
    %1 = arith.truncf %0 : vector<8x512xf32> to vector<8x512xbf16>
    %c0_1 = arith.constant 0 : index
    %c0_2 = arith.constant 0 : index
    %2 = vector.load %arg2[%c0_1, %c0_2] : memref<512x512xbf16, #tpu.memory_space<vmem>>, vector<512x512xbf16>
    %cst = arith.constant dense<0.000000e+00> : vector<8x512xf32>
    %3 = tpu.matmul %1, %2, %cst {dimension_numbers = #tpu.dot_dimension_numbers<[1], [0], [0], [1], [0, 0, 1, 1], [], []>} : vector<8x512xbf16>, vector<512x512xbf16>, vector<8x512xf32> -> vector<8x512xf32>
    %c0_3 = arith.constant 0 : index
    %c0_4 = arith.constant 0 : index
    %4 = vector.load %arg3[%c0_3, %c0_4] : memref<1x512xf32, #tpu.memory_space<vmem>>, vector<1x512xf32>
    %5 = vector.broadcast %4 : vector<1x512xf32> to vector<8x512xf32>
    %6 = arith.addf %3, %5 : vector<8x512xf32>
    %7 = math.tanh %6 : vector<8x512xf32>
    %8 = arith.truncf %7 : vector<8x512xf32> to vector<8x512xbf16>
    %c0_5 = arith.constant 0 : index
    %c0_6 = arith.constant 0 : index
    %9 = vector.load %arg4[%c0_5, %c0_6] : memref<512x512xbf16, #tpu.memory_space<vmem>>, vector<512x512xbf16>
    %cst_7 = arith.constant dense<0.000000e+00> : vector<8x512xf32>
    %10 = tpu.matmul %8, %9, %cst_7 {dimension_numbers = #tpu.dot_dimension_numbers<[1], [0], [0], [1], [0, 0, 1, 1], [], []>} : vector<8x512xbf16>, vector<512x512xbf16>, vector<8x512xf32> -> vector<8x512xf32>
    %cst_8 = arith.constant dense<0xFF800000> : vector<8xf32>
    %11 = vector.multi_reduction <maximumf>, %10, %cst_8 [1] : vector<8x512xf32> to vector<8xf32>
    %12 = vector.shape_cast %11 : vector<8xf32> to vector<8x1xf32>
    %13 = vector.broadcast %12 : vector<8x1xf32> to vector<8x512xf32>
    %14 = arith.subf %10, %13 : vector<8x512xf32>
    %15 = math.exp %14 : vector<8x512xf32>
    %cst_9 = arith.constant dense<0.000000e+00> : vector<8xf32>
    %16 = vector.multi_reduction <add>, %15, %cst_9 [1] : vector<8x512xf32> to vector<8xf32>
    %17 = vector.shape_cast %16 : vector<8xf32> to vector<8x1xf32>
    %18 = vector.broadcast %17 : vector<8x1xf32> to vector<8x512xf32>
    %19 = arith.divf %15, %18 : vector<8x512xf32>
    %20 = arith.mulf %19, %0 : vector<8x512xf32>
    %21 = arith.truncf %20 : vector<8x512xf32> to vector<8x512xbf16>
    %c0_10 = arith.constant 0 : index
    %c0_11 = arith.constant 0 : index
    %22 = vector.load %arg5[%c0_10, %c0_11] : memref<512x128xbf16, #tpu.memory_space<vmem>>, vector<512x128xbf16>
    %cst_12 = arith.constant dense<0.000000e+00> : vector<8x128xf32>
    %23 = tpu.matmul %21, %22, %cst_12 {dimension_numbers = #tpu.dot_dimension_numbers<[1], [0], [0], [1], [0, 0, 1, 1], [], []>} : vector<8x512xbf16>, vector<512x128xbf16>, vector<8x128xf32> -> vector<8x128xf32>
    %c0_13 = arith.constant 0 : index
    %c0_14 = arith.constant 0 : index
    %24 = vector.load %arg6[%c0_13, %c0_14] : memref<1x128xf32, #tpu.memory_space<vmem>>, vector<1x128xf32>
    %25 = vector.broadcast %24 : vector<1x128xf32> to vector<8x128xf32>
    %26 = arith.addf %23, %25 : vector<8x128xf32>
    %27 = vector.extract_strided_slice %26 {offsets = [0, 0], sizes = [8, 2], strides = [1, 1]} : vector<8x128xf32> to vector<8x2xf32>
    %c0_15 = arith.constant 0 : index
    %c0_16 = arith.constant 0 : index
    %28 = vector.load %arg7[%c0_15, %c0_16] : memref<8x2xf32, #tpu.memory_space<vmem>>, vector<8x2xf32>
    tpu.vector_store %arg7[%c0_15, %c0_16], %27 {strides = array<i32>} : memref<8x2xf32, #tpu.memory_space<vmem>>, vector<8x2xf32>,
    return
  }
  func.func @transform_0(%arg0: i32) -> (i32, i32) {
    %c0_i32 = arith.constant 0 : i32
    %c0_i32_0 = arith.constant 0 : i32
    return %arg0, %c0_i32 : i32, i32
  }
  func.func @transform_1(%arg0: i32) -> (i32, i32) {
    %c0_i32 = arith.constant 0 : i32
    %c0_i32_0 = arith.constant 0 : i32
    %c0_i32_1 = arith.constant 0 : i32
    return %c0_i32, %c0_i32_0 : i32, i32
  }
  func.func @transform_2(%arg0: i32) -> (i32, i32) {
    %c0_i32 = arith.constant 0 : i32
    %c0_i32_0 = arith.constant 0 : i32
    %c0_i32_1 = arith.constant 0 : i32
    return %c0_i32, %c0_i32_0 : i32, i32
  }
  func.func @transform_3(%arg0: i32) -> (i32, i32) {
    %c0_i32 = arith.constant 0 : i32
    %c0_i32_0 = arith.constant 0 : i32
    %c0_i32_1 = arith.constant 0 : i32
    return %c0_i32, %c0_i32_0 : i32, i32
  }
  func.func @transform_4(%arg0: i32) -> (i32, i32) {
    %c0_i32 = arith.constant 0 : i32
    %c0_i32_0 = arith.constant 0 : i32
    %c0_i32_1 = arith.constant 0 : i32
    return %c0_i32, %c0_i32_0 : i32, i32
  }
  func.func @transform_5(%arg0: i32) -> (i32, i32) {
    %c0_i32 = arith.constant 0 : i32
    %c0_i32_0 = arith.constant 0 : i32
    %c0_i32_1 = arith.constant 0 : i32
    return %c0_i32, %c0_i32_0 : i32, i32
  }
  func.func @transform_6(%arg0: i32) -> (i32, i32) {
    %c0_i32 = arith.constant 0 : i32
    %c0_i32_0 = arith.constant 0 : i32
    return %arg0, %c0_i32 : i32, i32
  }
}

</mosaic_0001>

<bundles_post_ra>
// kernel: attention_forward.1
= control target key start
LH: loop header
LB: loop body
LE: loop exit
PB: predicated region body
PF: predicated region fallthrough
CT: control target
= control target key end

     0   :  { %11 = vsyncpa [#allocation3], 0  ;;  %s3380_s0 = inlined_call_operand.hbm [shape: f32[8,512], index: 0, kind: input, shape index: {}]   ;;  %s3381_s1 = inlined_call_operand.hbm [shape: bf16[512,512], index: 1, kind: input, shape index: {}]   ;;  %s3382_s2 = inlined_call_operand.vmem [shape: f32[1,512], index: 2, kind: input, shape index: {}]   ;;  %s3383_s3 = inlined_call_operand.hbm [shape: bf16[512,512], index: 3, kind: input, shape index: {}]   ;;  %s3384_s4 = inlined_call_operand.hbm [shape: bf16[512,128], index: 4, kind: input, shape index: {}]   ;;  %s3385_s5 = inlined_call_operand.vmem [shape: f32[1,128], index: 5, kind: input, shape index: {}]   ;;  %s3386_s6 = inlined_call_operand.vmem [shape: f32[8,2], index: 6, kind: output, shape index: {}]  }
   0x1   :  { %12 = vsyncpa [#allocation5], 0 }
   0x2   :  { %13 = vsyncpa [#allocation8], 0  ;;  %s3259_s21 = smov [#allocation4]   ;;  %s3165_s25 = scalar_lea.hbm %s3381_s1, 16384 }
   0x3   :  { %s29_s22 = sshll.u32 %s3259_s21, 4  ;;  %p3166_p0 = scmp.ne.s32.totalorder %s3381_s1, %s3165_s25  ;;  %s30_s22 = int_to_ptr.vmem [resolvable:$true] %s29_s22 }
   0x4   :  { %p3169_p1 = scmp.lt.u32.totalorder %s3165_s25, %s3381_s1 }
   0x6   :  { %p3171_p2 = pnand %p3169_p1, %p3166_p0 }
   0x8   :  { %3174 = shalt.err (!%p3171_p2)
}
   0x9   :  { %s3175_s30 = scalar_lea.vmem %s30_s22, 16384  ;;  %p3180_p4 = scmp.lt.s32.totalorder %s30_s22, %s30_s22 }
   0xa   :  { %p3176_p3 = scmp.ne.s32.totalorder %s30_s22, %s3175_s30  ;;  %p3181_p5 = scmp.lt.s32.totalorder %s3175_s30, %s3175_s30 }
   0xc   :  { %p3182_p6 = por %p3181_p5, %p3180_p4 }
   0xe   :  { %p3183_p7 = pnand %p3182_p6, %p3176_p3 }
  0x10   :  { %3186 = shalt.err (!%p3183_p7)
}
  0x11   :  { %s3260_s7 = smov 256   ;;  %s3261_s8 = smov 16  }
  0x12   :  { %35 = dma.hbm_to_vmem [thread:$0]  %s3381_s1, 16384, %s30_s22, [#allocation5], %s3260_s7, %s3260_s7, %s3261_s8  }
  0x13   :  { %s3262_s11 = smov [#allocation2]   ;;  %s3263_s13 = smov [#allocation6]  }
  0x14   :  { %s20_s12 = sshll.u32 %s3262_s11, 4  ;;  %s43_s14 = sshll.u32 %s3263_s13, 4  ;;  %s21_s12 = int_to_ptr.vmem [resolvable:$true] %s20_s12  ;;  %s44_s14 = int_to_ptr.vmem [resolvable:$true] %s43_s14 }
  0x15   :  { %s3187_s17 = scalar_lea.hbm %s3380_s0, 512 }
  0x16   :  { %p3188_p8 = scmp.ne.s32.totalorder %s3380_s0, %s3187_s17  ;;  %p3191_p9 = scmp.lt.u32.totalorder %s3187_s17, %s3380_s0 }
  0x18   :  { %p3193_p10 = pnand %p3191_p9, %p3188_p8 }
  0x1a   :  { %3196 = shalt.err (!%p3193_p10)
}
  0x1b   :  { %s3197_s1 = scalar_lea.vmem %s21_s12, 512  ;;  %p3202_p12 = scmp.lt.s32.totalorder %s21_s12, %s21_s12 }
  0x1c   :  { %p3198_p11 = scmp.ne.s32.totalorder %s21_s12, %s3197_s1  ;;  %p3203_p13 = scmp.lt.s32.totalorder %s3197_s1, %s3197_s1 }
  0x1e   :  { %p3204_p0 = por %p3203_p13, %p3202_p12 }
  0x20   :  { %p3205_p1 = pnand %p3204_p0, %p3198_p11 }
  0x22   :  { %3208 = shalt.err (!%p3205_p1)
}
  0x23   :  { %23 = dma.hbm_to_vmem [thread:$0]  %s3380_s0, 512, %s21_s12, [#allocation3]  }
  0x24   :  { %s3209_s26 = scalar_lea.hbm %s3383_s3, 16384 }
  0x25   :  { %p3210_p2 = scmp.ne.s32.totalorder %s3383_s3, %s3209_s26  ;;  %p3213_p3 = scmp.lt.u32.totalorder %s3209_s26, %s3383_s3 }
  0x27   :  { %p3215_p4 = pnand %p3213_p3, %p3210_p2 }
  0x29   :  { %3218 = shalt.err (!%p3215_p4)
}
  0x2a   :  { %s3219_s9 = scalar_lea.vmem %s44_s14, 16384  ;;  %p3224_p6 = scmp.lt.s32.totalorder %s44_s14, %s44_s14 }
  0x2b   :  { %p3220_p5 = scmp.ne.s32.totalorder %s44_s14, %s3219_s9  ;;  %p3225_p7 = scmp.lt.s32.totalorder %s3219_s9, %s3219_s9 }
  0x2d   :  { %p3226_p8 = por %p3225_p7, %p3224_p6 }
  0x2f   :  { %p3227_p9 = pnand %p3226_p8, %p3220_p5 }
  0x31   :  { %3230 = shalt.err (!%p3227_p9)
}
  0x32   :  { %49 = dma.hbm_to_vmem [thread:$0]  %s3383_s3, 16384, %s44_s14, [#allocation5], %s3260_s7, %s3260_s7, %s3261_s8  }
  0x33   :  { %s3264_s11 = smov [#allocation7]   ;;  %s3231_s16 = scalar_lea.hbm %s3384_s4, 4096 }
  0x34   :  { %s55_s12 = sshll.u32 %s3264_s11, 4  ;;  %p3232_p10 = scmp.ne.s32.totalorder %s3384_s4, %s3231_s16  ;;  %s56_s12 = int_to_ptr.vmem [resolvable:$true] %s55_s12 }
  0x35   :  { %p3235_p11 = scmp.lt.u32.totalorder %s3231_s16, %s3384_s4 }
  0x37   :  { %p3237_p12 = pnand %p3235_p11, %p3232_p10 }
  0x39   :  { %3240 = shalt.err (!%p3237_p12)
}
  0x3a   :  { %s3241_s21 = scalar_lea.vmem %s56_s12, 4096  ;;  %p3246_p0 = scmp.lt.s32.totalorder %s56_s12, %s56_s12 }
  0x3b   :  { %p3242_p13 = scmp.ne.s32.totalorder %s56_s12, %s3241_s21  ;;  %p3247_p1 = scmp.lt.s32.totalorder %s3241_s21, %s3241_s21 }
  0x3d   :  { %p3248_p2 = por %p3247_p1, %p3246_p0 }
  0x3f   :  { %p3249_p3 = pnand %p3248_p2, %p3242_p13 }
  0x41   :  { %3252 = shalt.err (!%p3249_p3)
}
  0x42   :  { %s3265_s3 = smov 64   ;;  %s3266_s7 = smov 4  }
  0x43   :  { %61 = dma.hbm_to_vmem [thread:$0]  %s3384_s4, 4096, %s56_s12, [#allocation8], %s3265_s3, %s3265_s3, %s3266_s7  }
  0x44   :  { %3253 = dma.done.wait [#allocation3], 512  }
  0x45   :  { %3254 = vsyncadd [#allocation3], 4294966784 }
  0x46   :  { %3255 = dma.done.wait [#allocation5], 32768  }
  0x47   :  { %3256 = vsyncadd [#allocation5], 4294934528 }
  0x48   :  { %3257 = dma.done.wait [#allocation8], 4096  }
  0x49   :  { %3258 = vsyncadd [#allocation8], 4294963200  ;;  %v2727_v0 = vld [vmem:[#allocation4 + $0x4] ss:$16 sps:$4 sm:$0xff]   ;;  %v2729_v1 = vld [vmem:[#allocation4 + $0xc] ss:$16 sps:$4 sm:$0xff]  }
  0x4a   :  { %875 = vmatprep.subr.bf16.mxu0 %v2727_v0  ;;  %v2731_v2 = vld [vmem:[#allocation4] ss:$16 sps:$4 sm:$0xff]   ;;  %v2732_v3 = vld [vmem:[#allocation4 + $0x8] ss:$16 sps:$4 sm:$0xff]   ;;  %957 = vmatprep.subr.bf16.mxu1 %v2729_v1  ;;  %v2733_v4 = vld [vmem:[#allocation4 + $0x24] ss:$16 sps:$4 sm:$0xff]  }
  0x4b   :  { %876 = vmatpush1.bf16.msra.mxu0 %v2731_v2  ;;  %958 = vmatpush1.bf16.msra.mxu1 %v2732_v3  ;;  %v2735_v5 = vld [vmem:[#allocation4 + $0x2c] ss:$16 sps:$4 sm:$0xff]   ;;  %v2737_v6 = vld [vmem:[#allocation4 + $0x20] ss:$16 sps:$4 sm:$0xff]   ;;  %v2738_v7 = vld [vmem:[#allocation4 + $0x28] ss:$16 sps:$4 sm:$0xff]  }
  0x4c   :  { %877 = vmatprep.subr.bf16.mxu0 %v2733_v4  ;;  %959 = vmatprep.subr.bf16.mxu1 %v2735_v5  ;;  %v2739_v8 = vld [vmem:[#allocation4 + $0x44] ss:$16 sps:$4 sm:$0xff]   ;;  %v2741_v9 = vld [vmem:[#allocation4 + $0x4c] ss:$16 sps:$4 sm:$0xff]   ;;  %v2743_v10 = vld [vmem:[#allocation4 + $0x40] ss:$16 sps:$4 sm:$0xff]  }
  0x4d   :  { %v2744_v11 = vld [vmem:[#allocation4 + $0x48] ss:$16 sps:$4 sm:$0xff]   ;;  %v2745_v12 = vld [vmem:[#allocation4 + $0x64] ss:$16 sps:$4 sm:$0xff]   ;;  %v2747_v13 = vld [vmem:[#allocation4 + $0x6c] ss:$16 sps:$4 sm:$0xff]  }
  0x4e   :  { %v2749_v14 = vld [vmem:[#allocation4 + $0x60] ss:$16 sps:$4 sm:$0xff]   ;;  %v2750_v15 = vld [vmem:[#allocation4 + $0x68] ss:$16 sps:$4 sm:$0xff]   ;;  %v2751_v16 = vld [vmem:[#allocation4 + $0x84] ss:$16 sps:$4 sm:$0xff]  }
  0x4f   :  { %878 = vmatpush1.bf16.msra.mxu0 %v2737_v6  ;;  %960 = vmatpush1.bf16.msra.mxu1 %v2738_v7  ;;  %v2753_v17 = vld [vmem:[#allocation4 + $0x8c] ss:$16 sps:$4 sm:$0xff]   ;;  %v2755_v18 = vld [vmem:[#allocation4 + $0x80] ss:$16 sps:$4 sm:$0xff]   ;;  %v2756_v19 = vld [vmem:[#allocation4 + $0x88] ss:$16 sps:$4 sm:$0xff]  }
  0x50   :  { %879 = vmatprep.subr.bf16.mxu0 %v2739_v8  ;;  %961 = vmatprep.subr.bf16.mxu1 %v2741_v9  ;;  %v2757_v20 = vld [vmem:[#allocation4 + $0xa4] ss:$16 sps:$4 sm:$0xff]   ;;  %v2759_v21 = vld [vmem:[#allocation4 + $0xac] ss:$16 sps:$4 sm:$0xff]   ;;  %v2761_v22 = vld [vmem:[#allocation4 + $0xa0] ss:$16 sps:$4 sm:$0xff]  }
  0x51   :  { %v2762_v23 = vld [vmem:[#allocation4 + $0xa8] ss:$16 sps:$4 sm:$0xff]   ;;  %v2763_v24 = vld [vmem:[#allocation4 + $0xc4] ss:$16 sps:$4 sm:$0xff]   ;;  %v2765_v25 = vld [vmem:[#allocation4 + $0xcc] ss:$16 sps:$4 sm:$0xff]  }
  0x52   :  { %v2767_v26 = vld [vmem:[#allocation4 + $0xc0] ss:$16 sps:$4 sm:$0xff]   ;;  %v2768_v27 = vld [vmem:[#allocation4 + $0xc8] ss:$16 sps:$4 sm:$0xff]   ;;  %v2769_v28 = vld [vmem:[#allocation4 + $0xe4] ss:$16 sps:$4 sm:$0xff]  }
  0x53   :  { %880 = vmatpush1.bf16.msra.mxu0 %v2743_v10  ;;  %962 = vmatpush1.bf16.msra.mxu1 %v2744_v11  ;;  %v2771_v29 = vld [vmem:[#allocation4 + $0xec] ss:$16 sps:$4 sm:$0xff]   ;;  %v2773_v30 = vld [vmem:[#allocation4 + $0xe0] ss:$16 sps:$4 sm:$0xff]   ;;  %v2774_v31 = vld [vmem:[#allocation4 + $0xe8] ss:$16 sps:$4 sm:$0xff]  }
  0x54   :  { %881 = vmatprep.subr.bf16.mxu0 %v2745_v12  ;;  %963 = vmatprep.subr.bf16.mxu1 %v2747_v13  ;;  %v2775_v32 = vld [vmem:[#allocation4 + $0x104] ss:$16 sps:$4 sm:$0xff]   ;;  %v2777_v33 = vld [vmem:[#allocation4 + $0x10c] ss:$16 sps:$4 sm:$0xff]   ;;  %v2779_v34 = vld [vmem:[#allocation4 + $0x100] ss:$16 sps:$4 sm:$0xff]  }
  0x55   :  { %v2780_v35 = vld [vmem:[#allocation4 + $0x108] ss:$16 sps:$4 sm:$0xff]   ;;  %v2781_v36 = vld [vmem:[#allocation4 + $0x124] ss:$16 sps:$4 sm:$0xff]   ;;  %v2783_v37 = vld [vmem:[#allocation4 + $0x12c] ss:$16 sps:$4 sm:$0xff]  }
  0x56   :  { %v2785_v38 = vld [vmem:[#allocation4 + $0x120] ss:$16 sps:$4 sm:$0xff]   ;;  %v2786_v39 = vld [vmem:[#allocation4 + $0x128] ss:$16 sps:$4 sm:$0xff]   ;;  %v2787_v40 = vld [vmem:[#allocation4 + $0x144] ss:$16 sps:$4 sm:$0xff]  }
  0x57   :  { %882 = vmatpush1.bf16.msra.mxu0 %v2749_v14  ;;  %964 = vmatpush1.bf16.msra.mxu1 %v2750_v15  ;;  %v2789_v41 = vld [vmem:[#allocation4 + $0x14c] ss:$16 sps:$4 sm:$0xff]   ;;  %v2791_v42 = vld [vmem:[#allocation4 + $0x140] ss:$16 sps:$4 sm:$0xff]   ;;  %v2792_v43 = vld [vmem:[#allocation4 + $0x148] ss:$16 sps:$4 sm:$0xff]  }
  0x58   :  { %883 = vmatprep.subr.bf16.mxu0 %v2751_v16  ;;  %965 = vmatprep.subr.bf16.mxu1 %v2753_v17  ;;  %v2793_v44 = vld [vmem:[#allocation4 + $0x164] ss:$16 sps:$4 sm:$0xff]   ;;  %v2795_v45 = vld [vmem:[#allocation4 + $0x16c] ss:$16 sps:$4 sm:$0xff]   ;;  %v2797_v47 = vld [vmem:[#allocation4 + $0x160] ss:$16 sps:$4 sm:$0xff]  }
  0x59   :  { %v78_v46 = vld [vmem:[#allocation2 + $0x8] sm:$0xff]  ;;  %v2799_v50 = vld [vmem:[#allocation4 + $0x184] ss:$16 sps:$4 sm:$0xff]   ;;  %v2803_v52 = vld [vmem:[#allocation4 + $0x180] ss:$16 sps:$4 sm:$0xff]   ;;  %vm2357_vm0 = vcmask 15360  }
  0x5a   :  { %v82_v48 = vpack.c.bf16 %v78_v46, %v78_v46  ;;  %v2798_v49 = vld [vmem:[#allocation4 + $0x168] ss:$16 sps:$4 sm:$0xff]   ;;  %v2801_v51 = vld [vmem:[#allocation4 + $0x18c] ss:$16 sps:$4 sm:$0xff]   ;;  %v2805_v54 = vld [vmem:[#allocation4 + $0x1a4] ss:$16 sps:$4 sm:$0xff]  }
  0x5b   :  { %884 = vmatpush1.bf16.msra.mxu0 %v2755_v18  ;;  %966 = vmatpush1.bf16.msra.mxu1 %v2756_v19  ;;  %v2804_v53 = vld [vmem:[#allocation4 + $0x188] ss:$16 sps:$4 sm:$0xff]   ;;  %v2807_v55 = vld [vmem:[#allocation4 + $0x1ac] ss:$16 sps:$4 sm:$0xff]   ;;  %v2809_v56 = vld [vmem:[#allocation4 + $0x1a0] ss:$16 sps:$4 sm:$0xff]  }
  0x5c   :  { %885 = vmatprep.subr.bf16.mxu0 %v2757_v20  ;;  %967 = vmatprep.subr.bf16.mxu1 %v2759_v21  ;;  %v2810_v57 = vld [vmem:[#allocation4 + $0x1a8] ss:$16 sps:$4 sm:$0xff]   ;;  %v2811_v58 = vld [vmem:[#allocation4 + $0x1c4] ss:$16 sps:$4 sm:$0xff]   ;;  %v2813_v59 = vld [vmem:[#allocation4 + $0x1cc] ss:$16 sps:$4 sm:$0xff]  }
  0x5d   :  { %907 = vmatprep.mubr.bf16.mxu0 %v82_v48  ;;  %989 = vmatprep.mubr.bf16.mxu1 %v82_v48  ;;  %v2815_v60 = vld [vmem:[#allocation4 + $0x1c0] ss:$16 sps:$4 sm:$0xff]   ;;  %v2816_v61 = vld [vmem:[#allocation4 + $0x1c8] ss:$16 sps:$4 sm:$0xff]   ;;  %v2817_v62 = vld [vmem:[#allocation4 + $0x1e4] ss:$16 sps:$4 sm:$0xff]  }
  0x5e   :  { %v2819_v63 = vld [vmem:[#allocation4 + $0x1ec] ss:$16 sps:$4 sm:$0xff]   ;;  %v2821_v0 = vld [vmem:[#allocation4 + $0x1e0] ss:$16 sps:$4 sm:$0xff]   ;;  %v2822_v1 = vld [vmem:[#allocation4 + $0x1e8] ss:$16 sps:$4 sm:$0xff]  }
  0x5f   :  { %886 = vmatpush1.bf16.msra.mxu0 %v2761_v22  ;;  %968 = vmatpush1.bf16.msra.mxu1 %v2762_v23  ;;  %v77_v2 = vld [vmem:[#allocation2] sm:$0xff]  ;;  %v2828_v4 = vld [vmem:[#allocation4 + $0x20c] ss:$16 sps:$4 sm:$0xff]   ;;  %v2826_v7 = vld [vmem:[#allocation4 + $0x208] ss:$16 sps:$4 sm:$0xff]  }
  0x60   :  { %887 = vmatprep.subr.bf16.mxu0 %v2763_v24  ;;  %969 = vmatprep.subr.bf16.mxu1 %v2765_v25  ;;  %v2825_v3 = vld [vmem:[#allocation4 + $0x204] ss:$16 sps:$4 sm:$0xff]   ;;  %v81_v5 = vpack.c.bf16 %v77_v2, %v77_v2  ;;  %v2823_v6 = vld [vmem:[#allocation4 + $0x200] ss:$16 sps:$4 sm:$0xff]   ;;  %v2834_v9 = vld [vmem:[#allocation4 + $0x22c] ss:$16 sps:$4 sm:$0xff]  }
  0x61   :  { %v2831_v8 = vld [vmem:[#allocation4 + $0x224] ss:$16 sps:$4 sm:$0xff]   ;;  %v2829_v10 = vld [vmem:[#allocation4 + $0x220] ss:$16 sps:$4 sm:$0xff]   ;;  %v2832_v11 = vld [vmem:[#allocation4 + $0x228] ss:$16 sps:$4 sm:$0xff]  }
  0x62   :  { %v2837_v12 = vld [vmem:[#allocation4 + $0x244] ss:$16 sps:$4 sm:$0xff]   ;;  %v2840_v13 = vld [vmem:[#allocation4 + $0x24c] ss:$16 sps:$4 sm:$0xff]   ;;  %v2835_v14 = vld [vmem:[#allocation4 + $0x240] ss:$16 sps:$4 sm:$0xff]  }
  0x63   :  { %888 = vmatpush1.bf16.msra.mxu0 %v2767_v26  ;;  %970 = vmatpush1.bf16.msra.mxu1 %v2768_v27  ;;  %v2838_v15 = vld [vmem:[#allocation4 + $0x248] ss:$16 sps:$4 sm:$0xff]   ;;  %v2843_v16 = vld [vmem:[#allocation4 + $0x264] ss:$16 sps:$4 sm:$0xff]   ;;  %v2846_v17 = vld [vmem:[#allocation4 + $0x26c] ss:$16 sps:$4 sm:$0xff]  }
  0x64   :  { %889 = vmatprep.subr.bf16.mxu0 %v2769_v28  ;;  %971 = vmatprep.subr.bf16.mxu1 %v2771_v29  ;;  %v2841_v18 = vld [vmem:[#allocation4 + $0x260] ss:$16 sps:$4 sm:$0xff]   ;;  %v2844_v19 = vld [vmem:[#allocation4 + $0x268] ss:$16 sps:$4 sm:$0xff]   ;;  %v2849_v20 = vld [vmem:[#allocation4 + $0x284] ss:$16 sps:$4 sm:$0xff]  }
  0x65   :  { %v2852_v21 = vld [vmem:[#allocation4 + $0x28c] ss:$16 sps:$4 sm:$0xff]   ;;  %v2847_v22 = vld [vmem:[#allocation4 + $0x280] ss:$16 sps:$4 sm:$0xff]   ;;  %v2850_v23 = vld [vmem:[#allocation4 + $0x288] ss:$16 sps:$4 sm:$0xff]  }
  0x66   :  { %v2855_v24 = vld [vmem:[#allocation4 + $0x2a4] ss:$16 sps:$4 sm:$0xff]   ;;  %v2858_v25 = vld [vmem:[#allocation4 + $0x2ac] ss:$16 sps:$4 sm:$0xff]   ;;  %v2853_v26 = vld [vmem:[#allocation4 + $0x2a0] ss:$16 sps:$4 sm:$0xff]  }
  0x67   :  { %890 = vmatpush1.bf16.msra.mxu0 %v2773_v30  ;;  %972 = vmatpush1.bf16.msra.mxu1 %v2774_v31  ;;  %v2856_v27 = vld [vmem:[#allocation4 + $0x2a8] ss:$16 sps:$4 sm:$0xff]   ;;  %v2861_v28 = vld [vmem:[#allocation4 + $0x2c4] ss:$16 sps:$4 sm:$0xff]   ;;  %v2864_v29 = vld [vmem:[#allocation4 + $0x2cc] ss:$16 sps:$4 sm:$0xff]  }
  0x68   :  { %891 = vmatprep.subr.bf16.mxu0 %v2775_v32  ;;  %973 = vmatprep.subr.bf16.mxu1 %v2777_v33  ;;  %v80_v30 = vld [vmem:[#allocation2 + $0x18] sm:$0xff]  ;;  %v2859_v31 = vld [vmem:[#allocation4 + $0x2c0] ss:$16 sps:$4 sm:$0xff]   ;;  %v2885_v46 = vld [vmem:[#allocation4 + $0x344] ss:$16 sps:$4 sm:$0xff]  }
  0x69   :  { %v2862_v32 = vld [vmem:[#allocation4 + $0x2c8] ss:$16 sps:$4 sm:$0xff]   ;;  %v84_v33 = vpack.c.bf16 %v80_v30, %v80_v30  ;;  %v2883_v48 = vld [vmem:[#allocation4 + $0x340] ss:$16 sps:$4 sm:$0xff]   ;;  %v2915_v2 = vld [vmem:[#allocation4 + $0x3e4] ss:$16 sps:$4 sm:$0xff]  }
  0x6a   :  { %v2949_v30 = vld [vmem:[#allocation6 + $0xa0] ss:$16 sps:$4 sm:$0xff]  }
  0x6b   :  { %892 = vmatpush1.bf16.msra.mxu0 %v2779_v34  ;;  %974 = vmatpush1.bf16.msra.mxu1 %v2780_v35  ;;  %v2867_v34 = vld [vmem:[#allocation4 + $0x2e4] ss:$16 sps:$4 sm:$0xff]   ;;  %v2870_v35 = vld [vmem:[#allocation4 + $0x2ec] ss:$16 sps:$4 sm:$0xff]  }
  0x6c   :  { %893 = vmatprep.subr.bf16.mxu0 %v2781_v36  ;;  %975 = vmatprep.subr.bf16.mxu1 %v2783_v37  ;;  %v2865_v36 = vld [vmem:[#allocation4 + $0x2e0] ss:$16 sps:$4 sm:$0xff]   ;;  %v2868_v37 = vld [vmem:[#allocation4 + $0x2e8] ss:$16 sps:$4 sm:$0xff]  }
  0x6f   :  { %894 = vmatpush1.bf16.msra.mxu0 %v2785_v38  ;;  %976 = vmatpush1.bf16.msra.mxu1 %v2786_v39  ;;  %v2873_v38 = vld [vmem:[#allocation4 + $0x304] ss:$16 sps:$4 sm:$0xff]   ;;  %v2876_v39 = vld [vmem:[#allocation4 + $0x30c] ss:$16 sps:$4 sm:$0xff]  }
  0x70   :  { %895 = vmatprep.subr.bf16.mxu0 %v2787_v40  ;;  %977 = vmatprep.subr.bf16.mxu1 %v2789_v41  ;;  %v2871_v40 = vld [vmem:[#allocation4 + $0x300] ss:$16 sps:$4 sm:$0xff]   ;;  %v2874_v41 = vld [vmem:[#allocation4 + $0x308] ss:$16 sps:$4 sm:$0xff]  }
  0x73   :  { %896 = vmatpush1.bf16.msra.mxu0 %v2791_v42  ;;  %978 = vmatpush1.bf16.msra.mxu1 %v2792_v43  ;;  %v2879_v42 = vld [vmem:[#allocation4 + $0x324] ss:$16 sps:$4 sm:$0xff]   ;;  %v2882_v43 = vld [vmem:[#allocation4 + $0x32c] ss:$16 sps:$4 sm:$0xff]  }
  0x74   :  { %897 = vmatprep.subr.bf16.mxu0 %v2793_v44  ;;  %979 = vmatprep.subr.bf16.mxu1 %v2795_v45  ;;  %v2877_v44 = vld [vmem:[#allocation4 + $0x320] ss:$16 sps:$4 sm:$0xff]   ;;  %v2880_v45 = vld [vmem:[#allocation4 + $0x328] ss:$16 sps:$4 sm:$0xff]  }
  0x77   :  { %898 = vmatpush1.bf16.msra.mxu0 %v2797_v47  ;;  %980 = vmatpush1.bf16.msra.mxu1 %v2798_v49  ;;  %v2888_v47 = vld [vmem:[#allocation4 + $0x34c] ss:$16 sps:$4 sm:$0xff]   ;;  %v2886_v49 = vld [vmem:[#allocation4 + $0x348] ss:$16 sps:$4 sm:$0xff]  }
  0x78   :  { %899 = vmatprep.subr.bf16.mxu0 %v2799_v50  ;;  %981 = vmatprep.subr.bf16.mxu1 %v2801_v51  ;;  %v2891_v50 = vld [vmem:[#allocation4 + $0x364] ss:$16 sps:$4 sm:$0xff]   ;;  %v2894_v51 = vld [vmem:[#allocation4 + $0x36c] ss:$16 sps:$4 sm:$0xff]  }
  0x7b   :  { %900 = vmatpush1.bf16.msra.mxu0 %v2803_v52  ;;  %982 = vmatpush1.bf16.msra.mxu1 %v2804_v53  ;;  %v2889_v52 = vld [vmem:[#allocation4 + $0x360] ss:$16 sps:$4 sm:$0xff]   ;;  %v2892_v53 = vld [vmem:[#allocation4 + $0x368] ss:$16 sps:$4 sm:$0xff]  }
  0x7c   :  { %901 = vmatprep.subr.bf16.mxu0 %v2805_v54  ;;  %983 = vmatprep.subr.bf16.mxu1 %v2807_v55  ;;  %v2897_v54 = vld [vmem:[#allocation4 + $0x384] ss:$16 sps:$4 sm:$0xff]   ;;  %v2900_v55 = vld [vmem:[#allocation4 + $0x38c] ss:$16 sps:$4 sm:$0xff]  }
  0x7f   :  { %902 = vmatpush1.bf16.msra.mxu0 %v2809_v56  ;;  %984 = vmatpush1.bf16.msra.mxu1 %v2810_v57  ;;  %v2895_v56 = vld [vmem:[#allocation4 + $0x380] ss:$16 sps:$4 sm:$0xff]   ;;  %v2898_v57 = vld [vmem:[#allocation4 + $0x388] ss:$16 sps:$4 sm:$0xff]  }
  0x80   :  { %903 = vmatprep.subr.bf16.mxu0 %v2811_v58  ;;  %985 = vmatprep.subr.bf16.mxu1 %v2813_v59  ;;  %v2903_v58 = vld [vmem:[#allocation4 + $0x3a4] ss:$16 sps:$4 sm:$0xff]   ;;  %v2906_v59 = vld [vmem:[#allocation4 + $0x3ac] ss:$16 sps:$4 sm:$0xff]  }
  0x83   :  { %904 = vmatpush1.bf16.msra.mxu0 %v2815_v60  ;;  %986 = vmatpush1.bf16.msra.mxu1 %v2816_v61  ;;  %v2901_v60 = vld [vmem:[#allocation4 + $0x3a0] ss:$16 sps:$4 sm:$0xff]   ;;  %v2904_v61 = vld [vmem:[#allocation4 + $0x3a8] ss:$16 sps:$4 sm:$0xff]  }
  0x84   :  { %905 = vmatprep.subr.bf16.mxu0 %v2817_v62  ;;  %987 = vmatprep.subr.bf16.mxu1 %v2819_v63  ;;  %v2909_v62 = vld [vmem:[#allocation4 + $0x3c4] ss:$16 sps:$4 sm:$0xff]   ;;  %v2912_v63 = vld [vmem:[#allocation4 + $0x3cc] ss:$16 sps:$4 sm:$0xff]  }
  0x87   :  { %906 = vmatpush1.bf16.msra.mxu0 %v2821_v0  ;;  %988 = vmatpush1.bf16.msra.mxu1 %v2822_v1  ;;  %v2907_v0 = vld [vmem:[#allocation4 + $0x3c0] ss:$16 sps:$4 sm:$0xff]   ;;  %v2910_v1 = vld [vmem:[#allocation4 + $0x3c8] ss:$16 sps:$4 sm:$0xff]  }
  0x88   :  { %916 = vmatprep.subr.bf16.mxu0 %v2825_v3  ;;  %998 = vmatprep.subr.bf16.mxu1 %v2828_v4  ;;  %v2918_v3 = vld [vmem:[#allocation4 + $0x3ec] ss:$16 sps:$4 sm:$0xff]   ;;  %v2913_v4 = vld [vmem:[#allocation4 + $0x3e0] ss:$16 sps:$4 sm:$0xff]  }
  0x8a   :  { %908 = vmatmul.mubr.bf16.vlgmr.msra.gmra.mrb[0].mxu0 %v81_v5  ;;  %990 = vmatmul.mubr.bf16.vlgmr.msra.gmra.mrb[0].mxu1 %v81_v5  ;;  %v2916_v5 = vld [vmem:[#allocation4 + $0x3e8] ss:$16 sps:$4 sm:$0xff]  }
  0x8b   :  { %917 = vmatpush1.bf16.msra.mxu0 %v2823_v6  ;;  %999 = vmatpush1.bf16.msra.mxu1 %v2826_v7  ;;  %v79_v6 = vld [vmem:[#allocation2 + $0x10] sm:$0xff] }
  0x8c   :  { %918 = vmatprep.subr.bf16.mxu0 %v2831_v8  ;;  %1000 = vmatprep.subr.bf16.mxu1 %v2834_v9  ;;  %v2921_v7 = vld [vmem:[#allocation6 + $0x4] ss:$16 sps:$4 sm:$0xff]   ;;  %v2924_v8 = vld [vmem:[#allocation6 + $0xc] ss:$16 sps:$4 sm:$0xff]   ;;  %v2919_v9 = vld [vmem:[#allocation6] ss:$16 sps:$4 sm:$0xff]  }
  0x8d   :  { %948 = vmatprep.mubr.bf16.mxu0 %v84_v33  ;;  %1030 = vmatprep.mubr.bf16.mxu1 %v84_v33  ;;  %v2960_v33 = vld [vmem:[#allocation6 + $0xcc] ss:$16 sps:$4 sm:$0xff]  }
  0x8f   :  { %919 = vmatpush1.bf16.msra.mxu0 %v2829_v10  ;;  %1001 = vmatpush1.bf16.msra.mxu1 %v2832_v11  ;;  %v2922_v10 = vld [vmem:[#allocation6 + $0x8] ss:$16 sps:$4 sm:$0xff]   ;;  %v83_v11 = vpack.c.bf16 %v79_v6, %v79_v6  ;;  %v3009_v6 = vld [vmem:[#allocation6 + $0x1e0] ss:$16 sps:$4 sm:$0xff]  }
  0x90   :  { %920 = vmatprep.subr.bf16.mxu0 %v2837_v12  ;;  %1002 = vmatprep.subr.bf16.mxu1 %v2840_v13  ;;  %v2927_v12 = vld [vmem:[#allocation6 + $0x24] ss:$16 sps:$4 sm:$0xff]   ;;  %v2930_v13 = vld [vmem:[#allocation6 + $0x2c] ss:$16 sps:$4 sm:$0xff]  }
  0x93   :  { %921 = vmatpush1.bf16.msra.mxu0 %v2835_v14  ;;  %1003 = vmatpush1.bf16.msra.mxu1 %v2838_v15  ;;  %v2925_v14 = vld [vmem:[#allocation6 + $0x20] ss:$16 sps:$4 sm:$0xff]   ;;  %v2928_v15 = vld [vmem:[#allocation6 + $0x28] ss:$16 sps:$4 sm:$0xff]  }
  0x94   :  { %922 = vmatprep.subr.bf16.mxu0 %v2843_v16  ;;  %1004 = vmatprep.subr.bf16.mxu1 %v2846_v17  ;;  %v2933_v16 = vld [vmem:[#allocation6 + $0x44] ss:$16 sps:$4 sm:$0xff]   ;;  %v2936_v17 = vld [vmem:[#allocation6 + $0x4c] ss:$16 sps:$4 sm:$0xff]  }
  0x97   :  { %923 = vmatpush1.bf16.msra.mxu0 %v2841_v18  ;;  %1005 = vmatpush1.bf16.msra.mxu1 %v2844_v19  ;;  %v2931_v18 = vld [vmem:[#allocation6 + $0x40] ss:$16 sps:$4 sm:$0xff]   ;;  %v2934_v19 = vld [vmem:[#allocation6 + $0x48] ss:$16 sps:$4 sm:$0xff]  }
  0x98   :  { %924 = vmatprep.subr.bf16.mxu0 %v2849_v20  ;;  %1006 = vmatprep.subr.bf16.mxu1 %v2852_v21  ;;  %v2939_v20 = vld [vmem:[#allocation6 + $0x64] ss:$16 sps:$4 sm:$0xff]   ;;  %v2942_v21 = vld [vmem:[#allocation6 + $0x6c] ss:$16 sps:$4 sm:$0xff]  }
  0x9b   :  { %925 = vmatpush1.bf16.msra.mxu0 %v2847_v22  ;;  %1007 = vmatpush1.bf16.msra.mxu1 %v2850_v23  ;;  %v2937_v22 = vld [vmem:[#allocation6 + $0x60] ss:$16 sps:$4 sm:$0xff]   ;;  %v2940_v23 = vld [vmem:[#allocation6 + $0x68] ss:$16 sps:$4 sm:$0xff]  }
  0x9c   :  { %926 = vmatprep.subr.bf16.mxu0 %v2855_v24  ;;  %1008 = vmatprep.subr.bf16.mxu1 %v2858_v25  ;;  %v2945_v24 = vld [vmem:[#allocation6 + $0x84] ss:$16 sps:$4 sm:$0xff]   ;;  %v2948_v25 = vld [vmem:[#allocation6 + $0x8c] ss:$16 sps:$4 sm:$0xff]  }
  0x9f   :  { %927 = vmatpush1.bf16.msra.mxu0 %v2853_v26  ;;  %1009 = vmatpush1.bf16.msra.mxu1 %v2856_v27  ;;  %v2943_v26 = vld [vmem:[#allocation6 + $0x80] ss:$16 sps:$4 sm:$0xff]   ;;  %v2946_v27 = vld [vmem:[#allocation6 + $0x88] ss:$16 sps:$4 sm:$0xff]  }
  0xa0   :  { %928 = vmatprep.subr.bf16.mxu0 %v2861_v28  ;;  %1010 = vmatprep.subr.bf16.mxu1 %v2864_v29  ;;  %v2951_v28 = vld [vmem:[#allocation6 + $0xa4] ss:$16 sps:$4 sm:$0xff]   ;;  %v2954_v29 = vld [vmem:[#allocation6 + $0xac] ss:$16 sps:$4 sm:$0xff]  }
  0xa3   :  { %929 = vmatpush1.bf16.msra.mxu0 %v2859_v31  ;;  %1011 = vmatpush1.bf16.msra.mxu1 %v2862_v32  ;;  %v2952_v31 = vld [vmem:[#allocation6 + $0xa8] ss:$16 sps:$4 sm:$0xff]   ;;  %v2957_v32 = vld [vmem:[#allocation6 + $0xc4] ss:$16 sps:$4 sm:$0xff]  }
  0xa4   :  { %930 = vmatprep.subr.bf16.mxu0 %v2867_v34  ;;  %1012 = vmatprep.subr.bf16.mxu1 %v2870_v35  ;;  %v2955_v34 = vld [vmem:[#allocation6 + $0xc0] ss:$16 sps:$4 sm:$0xff]   ;;  %v2958_v35 = vld [vmem:[#allocation6 + $0xc8] ss:$16 sps:$4 sm:$0xff]  }
  0xa7   :  { %931 = vmatpush1.bf16.msra.mxu0 %v2865_v36  ;;  %1013 = vmatpush1.bf16.msra.mxu1 %v2868_v37  ;;  %v2963_v36 = vld [vmem:[#allocation6 + $0xe4] ss:$16 sps:$4 sm:$0xff]   ;;  %v2966_v37 = vld [vmem:[#allocation6 + $0xec] ss:$16 sps:$4 sm:$0xff]  }
  0xa8   :  { %932 = vmatprep.subr.bf16.mxu0 %v2873_v38  ;;  %1014 = vmatprep.subr.bf16.mxu1 %v2876_v39  ;;  %v2961_v38 = vld [vmem:[#allocation6 + $0xe0] ss:$16 sps:$4 sm:$0xff]   ;;  %v2964_v39 = vld [vmem:[#allocation6 + $0xe8] ss:$16 sps:$4 sm:$0xff]  }
  0xab   :  { %933 = vmatpush1.bf16.msra.mxu0 %v2871_v40  ;;  %1015 = vmatpush1.bf16.msra.mxu1 %v2874_v41  ;;  %v2969_v40 = vld [vmem:[#allocation6 + $0x104] ss:$16 sps:$4 sm:$0xff]   ;;  %v2972_v41 = vld [vmem:[#allocation6 + $0x10c] ss:$16 sps:$4 sm:$0xff]  }
  0xac   :  { %934 = vmatprep.subr.bf16.mxu0 %v2879_v42  ;;  %1016 = vmatprep.subr.bf16.mxu1 %v2882_v43  ;;  %v2967_v42 = vld [vmem:[#allocation6 + $0x100] ss:$16 sps:$4 sm:$0xff]   ;;  %v2970_v43 = vld [vmem:[#allocation6 + $0x108] ss:$16 sps:$4 sm:$0xff]  }
  0xaf   :  { %935 = vmatpush1.bf16.msra.mxu0 %v2877_v44  ;;  %1017 = vmatpush1.bf16.msra.mxu1 %v2880_v45  ;;  %v2975_v44 = vld [vmem:[#allocation6 + $0x124] ss:$16 sps:$4 sm:$0xff]   ;;  %v2978_v45 = vld [vmem:[#allocation6 + $0x12c] ss:$16 sps:$4 sm:$0xff]  }
  0xb0   :  { %936 = vmatprep.subr.bf16.mxu0 %v2885_v46  ;;  %1018 = vmatprep.subr.bf16.mxu1 %v2888_v47  ;;  %v2973_v46 = vld [vmem:[#allocation6 + $0x120] ss:$16 sps:$4 sm:$0xff]   ;;  %v2976_v47 = vld [vmem:[#allocation6 + $0x128] ss:$16 sps:$4 sm:$0xff]  }
  0xb3   :  { %937 = vmatpush1.bf16.msra.mxu0 %v2883_v48  ;;  %1019 = vmatpush1.bf16.msra.mxu1 %v2886_v49  ;;  %v2981_v48 = vld [vmem:[#allocation6 + $0x144] ss:$16 sps:$4 sm:$0xff]   ;;  %v2984_v49 = vld [vmem:[#allocation6 + $0x14c] ss:$16 sps:$4 sm:$0xff]  }
  0xb4   :  { %938 = vmatprep.subr.bf16.mxu0 %v2891_v50  ;;  %1020 = vmatprep.subr.bf16.mxu1 %v2894_v51  ;;  %v2979_v50 = vld [vmem:[#allocation6 + $0x140] ss:$16 sps:$4 sm:$0xff]   ;;  %v2982_v51 = vld [vmem:[#allocation6 + $0x148] ss:$16 sps:$4 sm:$0xff]  }
  0xb7   :  { %939 = vmatpush1.bf16.msra.mxu0 %v2889_v52  ;;  %1021 = vmatpush1.bf16.msra.mxu1 %v2892_v53  ;;  %v2987_v52 = vld [vmem:[#allocation6 + $0x164] ss:$16 sps:$4 sm:$0xff]   ;;  %v2990_v53 = vld [vmem:[#allocation6 + $0x16c] ss:$16 sps:$4 sm:$0xff]  }
  0xb8   :  { %940 = vmatprep.subr.bf16.mxu0 %v2897_v54  ;;  %1022 = vmatprep.subr.bf16.mxu1 %v2900_v55  ;;  %v2985_v54 = vld [vmem:[#allocation6 + $0x160] ss:$16 sps:$4 sm:$0xff]   ;;  %v2988_v55 = vld [vmem:[#allocation6 + $0x168] ss:$16 sps:$4 sm:$0xff]  }
  0xbb   :  { %941 = vmatpush1.bf16.msra.mxu0 %v2895_v56  ;;  %1023 = vmatpush1.bf16.msra.mxu1 %v2898_v57  ;;  %v2993_v56 = vld [vmem:[#allocation6 + $0x184] ss:$16 sps:$4 sm:$0xff]   ;;  %v2996_v57 = vld [vmem:[#allocation6 + $0x18c] ss:$16 sps:$4 sm:$0xff]  }
  0xbc   :  { %942 = vmatprep.subr.bf16.mxu0 %v2903_v58  ;;  %1024 = vmatprep.subr.bf16.mxu1 %v2906_v59  ;;  %v2991_v58 = vld [vmem:[#allocation6 + $0x180] ss:$16 sps:$4 sm:$0xff]   ;;  %v2994_v59 = vld [vmem:[#allocation6 + $0x188] ss:$16 sps:$4 sm:$0xff]  }
  0xbf   :  { %943 = vmatpush1.bf16.msra.mxu0 %v2901_v60  ;;  %1025 = vmatpush1.bf16.msra.mxu1 %v2904_v61  ;;  %v2999_v60 = vld [vmem:[#allocation6 + $0x1a4] ss:$16 sps:$4 sm:$0xff]   ;;  %v3002_v61 = vld [vmem:[#allocation6 + $0x1ac] ss:$16 sps:$4 sm:$0xff]  }
  0xc0   :  { %944 = vmatprep.subr.bf16.mxu0 %v2909_v62  ;;  %1026 = vmatprep.subr.bf16.mxu1 %v2912_v63  ;;  %v2997_v62 = vld [vmem:[#allocation6 + $0x1a0] ss:$16 sps:$4 sm:$0xff]   ;;  %v3000_v63 = vld [vmem:[#allocation6 + $0x1a8] ss:$16 sps:$4 sm:$0xff]  }
  0xc3   :  { %945 = vmatpush1.bf16.msra.mxu0 %v2907_v0  ;;  %1027 = vmatpush1.bf16.msra.mxu1 %v2910_v1  ;;  %v3005_v0 = vld [vmem:[#allocation6 + $0x1c4] ss:$16 sps:$4 sm:$0xff]   ;;  %v3008_v1 = vld [vmem:[#allocation6 + $0x1cc] ss:$16 sps:$4 sm:$0xff]  }
  0xc4   :  { %946 = vmatprep.subr.bf16.mxu0 %v2915_v2  ;;  %1028 = vmatprep.subr.bf16.mxu1 %v2918_v3  ;;  %v3003_v2 = vld [vmem:[#allocation6 + $0x1c0] ss:$16 sps:$4 sm:$0xff]   ;;  %v3006_v3 = vld [vmem:[#allocation6 + $0x1c8] ss:$16 sps:$4 sm:$0xff]  }
  0xc7   :  { %947 = vmatpush1.bf16.msra.mxu0 %v2913_v4  ;;  %1029 = vmatpush1.bf16.msra.mxu1 %v2916_v5  ;;  %v3011_v4 = vld [vmem:[#allocation6 + $0x1e4] ss:$16 sps:$4 sm:$0xff]   ;;  %v3014_v5 = vld [vmem:[#allocation6 + $0x1ec] ss:$16 sps:$4 sm:$0xff]  }
  0xc8   :  { %1815 = vmatprep.subr.bf16.mxu0 %v2921_v7  ;;  %1897 = vmatprep.subr.bf16.mxu1 %v2924_v8  ;;  %v3012_v7 = vld [vmem:[#allocation6 + $0x1e8] ss:$16 sps:$4 sm:$0xff]   ;;  %v3017_v8 = vld [vmem:[#allocation6 + $0x204] ss:$16 sps:$4 sm:$0xff]  }
  0xca   :  { %949 = vmatmul.mubr.bf16.vlgmr.msra.gmra.mrb[0].mxu0 %v83_v11  ;;  %1031 = vmatmul.mubr.bf16.vlgmr.msra.gmra.mrb[0].mxu1 %v83_v11 }
  0xcb   :  { %1816 = vmatpush1.bf16.msra.mxu0 %v2919_v9  ;;  %1898 = vmatpush1.bf16.msra.mxu1 %v2922_v10  ;;  %v3020_v9 = vld [vmem:[#allocation6 + $0x20c] ss:$16 sps:$4 sm:$0xff]   ;;  %v215_v10 = vlaneseq }
  0xcc   :  { %1817 = vmatprep.subr.bf16.mxu0 %v2927_v12  ;;  %1899 = vmatprep.subr.bf16.mxu1 %v2930_v13  ;;  %v3362_v13 = vld [vmem:[%s3382_s2] sm:$0xf] }
  0xcd   :  { %v3356_v11 = vshrl.u32 %v215_v10, 7  ;;  %v3077_v10 = vld [vmem:[#allocation6 + $0x344] ss:$16 sps:$4 sm:$0xff]  }
  0xcf   :  { %1818 = vmatpush1.bf16.msra.mxu0 %v2925_v14  ;;  %1900 = vmatpush1.bf16.msra.mxu1 %v2928_v15  ;;  %v217_v12 = vsub.s32 0, %v3356_v11  ;;  %v221_v14 = vsub.s32 1, %v3356_v11  ;;  %v229_v15 = vsub.s32 3, %v3356_v11 }
  0xd0   :  { %1819 = vmatprep.subr.bf16.mxu0 %v2933_v16  ;;  %1901 = vmatprep.subr.bf16.mxu1 %v2936_v17 }
  0xd1   :  { %v218_v16 = vrot.slane %v3362_v13, %v217_v12  ;;  %v222_v17 = vrot.slane %v3362_v13, %v221_v14  ;;  %v3080_v12 = vld [vmem:[#allocation6 + $0x34c] ss:$16 sps:$4 sm:$0xff]   ;;  %v225_v14 = vsub.s32 2, %v3356_v11 }
  0xd3   :  { %1820 = vmatpush1.bf16.msra.mxu0 %v2931_v18  ;;  %1902 = vmatpush1.bf16.msra.mxu1 %v2934_v19  ;;  %v230_v18 = vrot.slane %v3362_v13, %v229_v15  ;;  %v3075_v15 = vld [vmem:[#allocation6 + $0x340] ss:$16 sps:$4 sm:$0xff]  }
  0xd4   :  { %1821 = vmatprep.subr.bf16.mxu0 %v2939_v20  ;;  %1903 = vmatprep.subr.bf16.mxu1 %v2942_v21 }
  0xd7   :  { %1822 = vmatpush1.bf16.msra.mxu0 %v2937_v22  ;;  %1904 = vmatpush1.bf16.msra.mxu1 %v2940_v23 }
  0xd8   :  { %1823 = vmatprep.subr.bf16.mxu0 %v2945_v24  ;;  %1905 = vmatprep.subr.bf16.mxu1 %v2948_v25 }
  0xdb   :  { %1824 = vmatpush1.bf16.msra.mxu0 %v2943_v26  ;;  %1906 = vmatpush1.bf16.msra.mxu1 %v2946_v27 }
  0xdc   :  { %1825 = vmatprep.subr.bf16.mxu0 %v2951_v28  ;;  %1907 = vmatprep.subr.bf16.mxu1 %v2954_v29 }
  0xdf   :  { %1826 = vmatpush1.bf16.msra.mxu0 %v2949_v30  ;;  %1908 = vmatpush1.bf16.msra.mxu1 %v2952_v31 }
  0xe0   :  { %1827 = vmatprep.subr.bf16.mxu0 %v2957_v32  ;;  %1909 = vmatprep.subr.bf16.mxu1 %v2960_v33 }
  0xe3   :  { %1828 = vmatpush1.bf16.msra.mxu0 %v2955_v34  ;;  %1910 = vmatpush1.bf16.msra.mxu1 %v2958_v35  ;;  %v3015_v34 = vld [vmem:[#allocation6 + $0x200] ss:$16 sps:$4 sm:$0xff]   ;;  %v3018_v35 = vld [vmem:[#allocation6 + $0x208] ss:$16 sps:$4 sm:$0xff]  }
  0xe4   :  { %1829 = vmatprep.subr.bf16.mxu0 %v2963_v36  ;;  %1911 = vmatprep.subr.bf16.mxu1 %v2966_v37  ;;  %v3023_v37 = vld [vmem:[#allocation6 + $0x224] ss:$16 sps:$4 sm:$0xff]  }
  0xe7   :  { %1830 = vmatpush1.bf16.msra.mxu0 %v2961_v38  ;;  %1912 = vmatpush1.bf16.msra.mxu1 %v2964_v39  ;;  %v3026_v38 = vld [vmem:[#allocation6 + $0x22c] ss:$16 sps:$4 sm:$0xff]  }
  0xe8   :  { %1831 = vmatprep.subr.bf16.mxu0 %v2969_v40  ;;  %1913 = vmatprep.subr.bf16.mxu1 %v2972_v41  ;;  %v3021_v40 = vld [vmem:[#allocation6 + $0x220] ss:$16 sps:$4 sm:$0xff]   ;;  %v3024_v41 = vld [vmem:[#allocation6 + $0x228] ss:$16 sps:$4 sm:$0xff]  }
  0xeb   :  { %1832 = vmatpush1.bf16.msra.mxu0 %v2967_v42  ;;  %1914 = vmatpush1.bf16.msra.mxu1 %v2970_v43  ;;  %v3029_v42 = vld [vmem:[#allocation6 + $0x244] ss:$16 sps:$4 sm:$0xff]   ;;  %v3032_v43 = vld [vmem:[#allocation6 + $0x24c] ss:$16 sps:$4 sm:$0xff]  }
  0xec   :  { %1833 = vmatprep.subr.bf16.mxu0 %v2975_v44  ;;  %1915 = vmatprep.subr.bf16.mxu1 %v2978_v45  ;;  %v3027_v44 = vld [vmem:[#allocation6 + $0x240] ss:$16 sps:$4 sm:$0xff]   ;;  %v3030_v45 = vld [vmem:[#allocation6 + $0x248] ss:$16 sps:$4 sm:$0xff]  }
  0xef   :  { %1834 = vmatpush1.bf16.msra.mxu0 %v2973_v46  ;;  %1916 = vmatpush1.bf16.msra.mxu1 %v2976_v47  ;;  %v3035_v46 = vld [vmem:[#allocation6 + $0x264] ss:$16 sps:$4 sm:$0xff]   ;;  %v3038_v47 = vld [vmem:[#allocation6 + $0x26c] ss:$16 sps:$4 sm:$0xff]  }
  0xf0   :  { %1835 = vmatprep.subr.bf16.mxu0 %v2981_v48  ;;  %1917 = vmatprep.subr.bf16.mxu1 %v2984_v49  ;;  %v3033_v48 = vld [vmem:[#allocation6 + $0x260] ss:$16 sps:$4 sm:$0xff]   ;;  %v3036_v49 = vld [vmem:[#allocation6 + $0x268] ss:$16 sps:$4 sm:$0xff]  }
  0xf3   :  { %1836 = vmatpush1.bf16.msra.mxu0 %v2979_v50  ;;  %1918 = vmatpush1.bf16.msra.mxu1 %v2982_v51  ;;  %v3041_v50 = vld [vmem:[#allocation6 + $0x284] ss:$16 sps:$4 sm:$0xff]   ;;  %v3044_v51 = vld [vmem:[#allocation6 + $0x28c] ss:$16 sps:$4 sm:$0xff]  }
  0xf4   :  { %1837 = vmatprep.subr.bf16.mxu0 %v2987_v52  ;;  %1919 = vmatprep.subr.bf16.mxu1 %v2990_v53  ;;  %v3039_v52 = vld [vmem:[#allocation6 + $0x280] ss:$16 sps:$4 sm:$0xff]   ;;  %v3042_v53 = vld [vmem:[#allocation6 + $0x288] ss:$16 sps:$4 sm:$0xff]  }
  0xf7   :  { %1838 = vmatpush1.bf16.msra.mxu0 %v2985_v54  ;;  %1920 = vmatpush1.bf16.msra.mxu1 %v2988_v55  ;;  %v3047_v54 = vld [vmem:[#allocation6 + $0x2a4] ss:$16 sps:$4 sm:$0xff]   ;;  %v3050_v55 = vld [vmem:[#allocation6 + $0x2ac] ss:$16 sps:$4 sm:$0xff]  }
  0xf8   :  { %1839 = vmatprep.subr.bf16.mxu0 %v2993_v56  ;;  %1921 = vmatprep.subr.bf16.mxu1 %v2996_v57  ;;  %v3045_v56 = vld [vmem:[#allocation6 + $0x2a0] ss:$16 sps:$4 sm:$0xff]   ;;  %v3048_v57 = vld [vmem:[#allocation6 + $0x2a8] ss:$16 sps:$4 sm:$0xff]  }
  0xfb   :  { %1840 = vmatpush1.bf16.msra.mxu0 %v2991_v58  ;;  %1922 = vmatpush1.bf16.msra.mxu1 %v2994_v59  ;;  %v3053_v58 = vld [vmem:[#allocation6 + $0x2c4] ss:$16 sps:$4 sm:$0xff]   ;;  %v3056_v59 = vld [vmem:[#allocation6 + $0x2cc] ss:$16 sps:$4 sm:$0xff]  }
  0xfc   :  { %1841 = vmatprep.subr.bf16.mxu0 %v2999_v60  ;;  %1923 = vmatprep.subr.bf16.mxu1 %v3002_v61  ;;  %v3051_v60 = vld [vmem:[#allocation6 + $0x2c0] ss:$16 sps:$4 sm:$0xff]   ;;  %v3054_v61 = vld [vmem:[#allocation6 + $0x2c8] ss:$16 sps:$4 sm:$0xff]  }
  0xff   :  { %1842 = vmatpush1.bf16.msra.mxu0 %v2997_v62  ;;  %1924 = vmatpush1.bf16.msra.mxu1 %v3000_v63  ;;  %v3059_v62 = vld [vmem:[#allocation6 + $0x2e4] ss:$16 sps:$4 sm:$0xff]   ;;  %v3062_v63 = vld [vmem:[#allocation6 + $0x2ec] ss:$16 sps:$4 sm:$0xff]  }
 0x100   :  { %1843 = vmatprep.subr.bf16.mxu0 %v3005_v0  ;;  %1925 = vmatprep.subr.bf16.mxu1 %v3008_v1  ;;  %v3057_v0 = vld [vmem:[#allocation6 + $0x2e0] ss:$16 sps:$4 sm:$0xff]   ;;  %v3060_v1 = vld [vmem:[#allocation6 + $0x2e8] ss:$16 sps:$4 sm:$0xff]  }
 0x103   :  { %1844 = vmatpush1.bf16.msra.mxu0 %v3003_v2  ;;  %1926 = vmatpush1.bf16.msra.mxu1 %v3006_v3  ;;  %v3065_v2 = vld [vmem:[#allocation6 + $0x304] ss:$16 sps:$4 sm:$0xff]   ;;  %v3068_v3 = vld [vmem:[#allocation6 + $0x30c] ss:$16 sps:$4 sm:$0xff]  }
 0x104   :  { %1845 = vmatprep.subr.bf16.mxu0 %v3011_v4  ;;  %1927 = vmatprep.subr.bf16.mxu1 %v3014_v5  ;;  %v3063_v4 = vld [vmem:[#allocation6 + $0x300] ss:$16 sps:$4 sm:$0xff]   ;;  %v3066_v5 = vld [vmem:[#allocation6 + $0x308] ss:$16 sps:$4 sm:$0xff]  }
 0x107   :  { %1846 = vmatpush1.bf16.msra.mxu0 %v3009_v6  ;;  %1928 = vmatpush1.bf16.msra.mxu1 %v3012_v7  ;;  %v3071_v6 = vld [vmem:[#allocation6 + $0x324] ss:$16 sps:$4 sm:$0xff]   ;;  %v3074_v7 = vld [vmem:[#allocation6 + $0x32c] ss:$16 sps:$4 sm:$0xff]  }
 0x108   :  { %1856 = vmatprep.subr.bf16.mxu0 %v3017_v8  ;;  %1938 = vmatprep.subr.bf16.mxu1 %v3020_v9  ;;  %v3069_v8 = vld [vmem:[#allocation6 + $0x320] ss:$16 sps:$4 sm:$0xff]   ;;  %v3072_v9 = vld [vmem:[#allocation6 + $0x328] ss:$16 sps:$4 sm:$0xff]  }
 0x19d   :  { %v950_v19 = vpop.f32.mrb[0].mxu0  ;;  %v3369_v20 = vpop.f32.mrb[0].mxu1 }
 0x19e   :  { %v2699_v21 = vadd.f32 %v950_v19, %v218_v16  ;;  %v952_v22 = vpop.f32.mrb[1].mxu0  ;;  %v1034_v23 = vpop.f32.mrb[1].mxu1  ;;  %v3078_v16 = vld [vmem:[#allocation6 + $0x348] ss:$16 sps:$4 sm:$0xff]   ;;  %v226_v19 = vrot.slane %v3362_v13, %v225_v14  ;;  %v3093_v13 = vld [vmem:[#allocation6 + $0x3a0] ss:$16 sps:$4 sm:$0xff]  }
 0x19f   :  { %v2700_v24 = vadd.f32 %v952_v22, %v222_v17  ;;  %v2702_v25 = vadd.f32 %v1034_v23, %v230_v18  ;;  %v954_v26 = vpop.f32.mrb[2].mxu0  ;;  %v1036_v27 = vpop.f32.mrb[2].mxu1  ;;  %v3083_v17 = vld [vmem:[#allocation6 + $0x364] ss:$16 sps:$4 sm:$0xff]   ;;  %v3086_v18 = vld [vmem:[#allocation6 + $0x36c] ss:$16 sps:$4 sm:$0xff]  }
 0x1a0   :  { %v955_v28 = vpop.f32.mrb[3].mxu0  ;;  %v1037_v29 = vpop.f32.mrb[3].mxu1  ;;  %3143 = vtanh.f32 %v2699_v21  ;;  %v3081_v21 = vld [vmem:[#allocation6 + $0x360] ss:$16 sps:$4 sm:$0xff]   ;;  %v3084_v22 = vld [vmem:[#allocation6 + $0x368] ss:$16 sps:$4 sm:$0xff]   ;;  %v2701_v11 = vadd.f32 %v3369_v20, %v226_v19 }
 0x1a1   :  { %3145 = vtanh.f32 %v2700_v24  ;;  %v3089_v23 = vld [vmem:[#allocation6 + $0x384] ss:$16 sps:$4 sm:$0xff]   ;;  %v3092_v24 = vld [vmem:[#allocation6 + $0x38c] ss:$16 sps:$4 sm:$0xff]   ;;  %v3090_v26 = vld [vmem:[#allocation6 + $0x388] ss:$16 sps:$4 sm:$0xff]  }
 0x1a2   :  { %3147 = vtanh.f32 %v2702_v25  ;;  %v3087_v25 = vld [vmem:[#allocation6 + $0x380] ss:$16 sps:$4 sm:$0xff]   ;;  %v3095_v27 = vld [vmem:[#allocation6 + $0x3a4] ss:$16 sps:$4 sm:$0xff]   ;;  %v3098_v28 = vld [vmem:[#allocation6 + $0x3ac] ss:$16 sps:$4 sm:$0xff]  }
 0x1a3   :  { %3149 = vtanh.f32 %v2701_v11  ;;  %v3096_v29 = vld [vmem:[#allocation6 + $0x3a8] ss:$16 sps:$4 sm:$0xff]   ;;  %v3099_v20 = vld [vmem:[#allocation6 + $0x3c0] ss:$16 sps:$4 sm:$0xff]  }
 0x1a4   :  { %v3131_v11 = vld [vmem:[#allocation7 + $0x68] sm:$0xff]  }
 0x1aa   :  { %v3144_v30 = vpop.eup %3143 }
 0x1ab   :  { %v3146_v31 = vpop.eup %3145  ;;  %v1043_v36 = vpack.c.bf16 %v3144_v30, %v3144_v30  ;;  %v3101_v30 = vld [vmem:[#allocation6 + $0x3c4] ss:$16 sps:$4 sm:$0xff]  }
 0x1ac   :  { %v3148_v32 = vpop.eup %3147  ;;  %v1044_v33 = vpack.c.bf16 %v3146_v31, %v3146_v31  ;;  %v3104_v31 = vld [vmem:[#allocation6 + $0x3cc] ss:$16 sps:$4 sm:$0xff]  }
 0x1ad   :  { %v1046_v39 = vpack.c.bf16 %v3148_v32, %v3148_v32  ;;  %v3102_v32 = vld [vmem:[#allocation6 + $0x3c8] ss:$16 sps:$4 sm:$0xff]  }
 0x1ae   :  { %1847 = vmatprep.mubr.bf16.mxu0 %v1044_v33  ;;  %1929 = vmatprep.mubr.bf16.mxu1 %v1044_v33  ;;  %v3107_v33 = vld [vmem:[#allocation6 + $0x3e4] ss:$16 sps:$4 sm:$0xff]  }
 0x1af   :  { %1848 = vmatmul.mubr.bf16.vlgmr.msra.gmra.mrb[4].mxu0 %v1043_v36  ;;  %1930 = vmatmul.mubr.bf16.vlgmr.msra.gmra.mrb[4].mxu1 %v1043_v36  ;;  %v3108_v36 = vld [vmem:[#allocation6 + $0x3e8] ss:$16 sps:$4 sm:$0xff]  }
 0x1b0   :  { %1857 = vmatpush1.bf16.msra.mxu0 %v3015_v34  ;;  %1939 = vmatpush1.bf16.msra.mxu1 %v3018_v35  ;;  %v3110_v34 = vld [vmem:[#allocation6 + $0x3ec] ss:$16 sps:$4 sm:$0xff]   ;;  %v3105_v35 = vld [vmem:[#allocation6 + $0x3e0] ss:$16 sps:$4 sm:$0xff]  }
 0x1b1   :  { %1888 = vmatprep.mubr.bf16.mxu0 %v1046_v39  ;;  %1970 = vmatprep.mubr.bf16.mxu1 %v1046_v39 }
 0x1b2   :  { %1858 = vmatprep.subr.bf16.mxu0 %v3023_v37  ;;  %1940 = vmatprep.subr.bf16.mxu1 %v3026_v38  ;;  %v3150_v37 = vpop.eup %3149 }
 0x1b3   :  { %v1045_v38 = vpack.c.bf16 %v3150_v37, %v3150_v37 }
 0x1b4   :  { %1859 = vmatpush1.bf16.msra.mxu0 %v3021_v40  ;;  %1941 = vmatpush1.bf16.msra.mxu1 %v3024_v41 }
 0x1b5   :  { %1860 = vmatprep.subr.bf16.mxu0 %v3029_v42  ;;  %1942 = vmatprep.subr.bf16.mxu1 %v3032_v43 }
 0x1b8   :  { %1861 = vmatpush1.bf16.msra.mxu0 %v3027_v44  ;;  %1943 = vmatpush1.bf16.msra.mxu1 %v3030_v45 }
 0x1b9   :  { %1862 = vmatprep.subr.bf16.mxu0 %v3035_v46  ;;  %1944 = vmatprep.subr.bf16.mxu1 %v3038_v47 }
 0x1bc   :  { %1863 = vmatpush1.bf16.msra.mxu0 %v3033_v48  ;;  %1945 = vmatpush1.bf16.msra.mxu1 %v3036_v49 }
 0x1bd   :  { %1864 = vmatprep.subr.bf16.mxu0 %v3041_v50  ;;  %1946 = vmatprep.subr.bf16.mxu1 %v3044_v51  ;;  %v3111_v50 = vld [vmem:[#allocation7 + $0x40] sm:$0xff]  }
 0x1be   :  { %v3112_v51 = vld [vmem:[#allocation7 + $0xc0] sm:$0xff]  }
 0x1c0   :  { %1865 = vmatpush1.bf16.msra.mxu0 %v3039_v52  ;;  %1947 = vmatpush1.bf16.msra.mxu1 %v3042_v53  ;;  %v3113_v52 = vld [vmem:[#allocation7] sm:$0xff]  }
 0x1c1   :  { %1866 = vmatprep.subr.bf16.mxu0 %v3047_v54  ;;  %1948 = vmatprep.subr.bf16.mxu1 %v3050_v55  ;;  %v3114_v53 = vld [vmem:[#allocation7 + $0x80] sm:$0xff]   ;;  %v3115_v54 = vld [vmem:[#allocation7 + $0x48] sm:$0xff]  }
 0x1c2   :  { %v3116_v55 = vld [vmem:[#allocation7 + $0xc8] sm:$0xff]  }
 0x1c4   :  { %1867 = vmatpush1.bf16.msra.mxu0 %v3045_v56  ;;  %1949 = vmatpush1.bf16.msra.mxu1 %v3048_v57  ;;  %v3117_v56 = vld [vmem:[#allocation7 + $0x8] sm:$0xff]  }
 0x1c5   :  { %1868 = vmatprep.subr.bf16.mxu0 %v3053_v58  ;;  %1950 = vmatprep.subr.bf16.mxu1 %v3056_v59  ;;  %v3118_v57 = vld [vmem:[#allocation7 + $0x88] sm:$0xff]   ;;  %v3119_v58 = vld [vmem:[#allocation7 + $0x50] sm:$0xff]  }
 0x1c6   :  { %v3120_v59 = vld [vmem:[#allocation7 + $0xd0] sm:$0xff]  }
 0x1c8   :  { %1869 = vmatpush1.bf16.msra.mxu0 %v3051_v60  ;;  %1951 = vmatpush1.bf16.msra.mxu1 %v3054_v61  ;;  %v3121_v60 = vld [vmem:[#allocation7 + $0x10] sm:$0xff]  }
 0x1c9   :  { %1870 = vmatprep.subr.bf16.mxu0 %v3059_v62  ;;  %1952 = vmatprep.subr.bf16.mxu1 %v3062_v63  ;;  %v3122_v61 = vld [vmem:[#allocation7 + $0x90] sm:$0xff]   ;;  %v3123_v62 = vld [vmem:[#allocation7 + $0x58] sm:$0xff]  }
 0x1ca   :  { %v3124_v63 = vld [vmem:[#allocation7 + $0xd8] sm:$0xff]  }
 0x1cc   :  { %1871 = vmatpush1.bf16.msra.mxu0 %v3057_v0  ;;  %1953 = vmatpush1.bf16.msra.mxu1 %v3060_v1  ;;  %v3125_v0 = vld [vmem:[#allocation7 + $0x18] sm:$0xff]  }
 0x1cd   :  { %1872 = vmatprep.subr.bf16.mxu0 %v3065_v2  ;;  %1954 = vmatprep.subr.bf16.mxu1 %v3068_v3  ;;  %v3126_v1 = vld [vmem:[#allocation7 + $0x98] sm:$0xff]  }
 0x1d0   :  { %1873 = vmatpush1.bf16.msra.mxu0 %v3063_v4  ;;  %1955 = vmatpush1.bf16.msra.mxu1 %v3066_v5 }
 0x1d1   :  { %1874 = vmatprep.subr.bf16.mxu0 %v3071_v6  ;;  %1956 = vmatprep.subr.bf16.mxu1 %v3074_v7 }
 0x1d4   :  { %1875 = vmatpush1.bf16.msra.mxu0 %v3069_v8  ;;  %1957 = vmatpush1.bf16.msra.mxu1 %v3072_v9 }
 0x1d5   :  { %1876 = vmatprep.subr.bf16.mxu0 %v3077_v10  ;;  %1958 = vmatprep.subr.bf16.mxu1 %v3080_v12 }
 0x1d8   :  { %1877 = vmatpush1.bf16.msra.mxu0 %v3075_v15  ;;  %1959 = vmatpush1.bf16.msra.mxu1 %v3078_v16 }
 0x1d9   :  { %1878 = vmatprep.subr.bf16.mxu0 %v3083_v17  ;;  %1960 = vmatprep.subr.bf16.mxu1 %v3086_v18 }
 0x1dc   :  { %1879 = vmatpush1.bf16.msra.mxu0 %v3081_v21  ;;  %1961 = vmatpush1.bf16.msra.mxu1 %v3084_v22  ;;  %v3127_v21 = vld [vmem:[#allocation7 + $0x60] sm:$0xff]  }
 0x1dd   :  { %1880 = vmatprep.subr.bf16.mxu0 %v3089_v23  ;;  %1962 = vmatprep.subr.bf16.mxu1 %v3092_v24  ;;  %v3128_v22 = vld [vmem:[#allocation7 + $0xe0] sm:$0xff]  }
 0x1de   :  { %v3129_v23 = vld [vmem:[#allocation7 + $0x20] sm:$0xff]  }
 0x1df   :  { %v3130_v24 = vld [vmem:[#allocation7 + $0xa0] sm:$0xff]  }
 0x1e0   :  { %1881 = vmatpush1.bf16.msra.mxu0 %v3087_v25  ;;  %1963 = vmatpush1.bf16.msra.mxu1 %v3090_v26  ;;  %v3132_v25 = vld [vmem:[#allocation7 + $0xe8] sm:$0xff]  }
 0x1e1   :  { %1882 = vmatprep.subr.bf16.mxu0 %v3095_v27  ;;  %1964 = vmatprep.subr.bf16.mxu1 %v3098_v28  ;;  %v3133_v26 = vld [vmem:[#allocation7 + $0x28] sm:$0xff]   ;;  %v3135_v28 = vld [vmem:[#allocation7 + $0x70] sm:$0xff]  }
 0x1e2   :  { %v3134_v27 = vld [vmem:[#allocation7 + $0xa8] sm:$0xff]  }
 0x1e4   :  { %1883 = vmatpush1.bf16.msra.mxu0 %v3093_v13  ;;  %1965 = vmatpush1.bf16.msra.mxu1 %v3096_v29  ;;  %v3136_v13 = vld [vmem:[#allocation7 + $0xf0] sm:$0xff]  }
 0x1e5   :  { %1884 = vmatprep.subr.bf16.mxu0 %v3101_v30  ;;  %1966 = vmatprep.subr.bf16.mxu1 %v3104_v31  ;;  %v3137_v29 = vld [vmem:[#allocation7 + $0x30] sm:$0xff]   ;;  %v3139_v31 = vld [vmem:[#allocation7 + $0x78] sm:$0xff]  }
 0x1e6   :  { %v3138_v30 = vld [vmem:[#allocation7 + $0xb0] sm:$0xff]  }
 0x1e8   :  { %1885 = vmatpush1.bf16.msra.mxu0 %v3099_v20  ;;  %1967 = vmatpush1.bf16.msra.mxu1 %v3102_v32  ;;  %v3140_v20 = vld [vmem:[#allocation7 + $0xf8] sm:$0xff]  }
 0x1e9   :  { %1886 = vmatprep.subr.bf16.mxu0 %v3107_v33  ;;  %1968 = vmatprep.subr.bf16.mxu1 %v3110_v34  ;;  %v3141_v32 = vld [vmem:[#allocation7 + $0x38] sm:$0xff]  }
 0x1ea   :  { %v3142_v33 = vld [vmem:[#allocation7 + $0xb8] sm:$0xff]  }
 0x1ec   :  { %1887 = vmatpush1.bf16.msra.mxu0 %v3105_v35  ;;  %1969 = vmatpush1.bf16.msra.mxu1 %v3108_v36 }
 0x1ed   :  { %2655 = vmatprep.subr.bf16.mxu0 %v3111_v50  ;;  %2677 = vmatprep.subr.bf16.mxu1 %v3112_v51 }
 0x1ef   :  { %1889 = vmatmul.mubr.bf16.vlgmr.msra.gmra.mrb[4].mxu0 %v1045_v38  ;;  %1971 = vmatmul.mubr.bf16.vlgmr.msra.gmra.mrb[4].mxu1 %v1045_v38 }
 0x1f0   :  { %2656 = vmatpush3.bf16.msra.mxu0 %v3113_v52  ;;  %2678 = vmatpush3.bf16.msra.mxu1 %v3114_v53 }
 0x1f1   :  { %2657 = vmatprep.subr.bf16.mxu0 %v3115_v54  ;;  %2679 = vmatprep.subr.bf16.mxu1 %v3116_v55  ;;  %v2622_v54 = vld [vmem:[%s3385_s5] ss:$0 sm:$0xff] }
 0x1f4   :  { %2658 = vmatpush3.bf16.msra.mxu0 %v3117_v56  ;;  %2680 = vmatpush3.bf16.msra.mxu1 %v3118_v57 }
 0x1f5   :  { %2659 = vmatprep.subr.bf16.mxu0 %v3119_v58  ;;  %2681 = vmatprep.subr.bf16.mxu1 %v3120_v59 }
 0x1f8   :  { %2660 = vmatpush3.bf16.msra.mxu0 %v3121_v60  ;;  %2682 = vmatpush3.bf16.msra.mxu1 %v3122_v61 }
 0x1f9   :  { %2661 = vmatprep.subr.bf16.mxu0 %v3123_v62  ;;  %2683 = vmatprep.subr.bf16.mxu1 %v3124_v63 }
 0x1fc   :  { %2662 = vmatpush3.bf16.msra.mxu0 %v3125_v0  ;;  %2684 = vmatpush3.bf16.msra.mxu1 %v3126_v1 }
 0x1fd   :  { %2663 = vmatprep.subr.bf16.mxu0 %v3127_v21  ;;  %2685 = vmatprep.subr.bf16.mxu1 %v3128_v22 }
 0x200   :  { %2664 = vmatpush3.bf16.msra.mxu0 %v3129_v23  ;;  %2686 = vmatpush3.bf16.msra.mxu1 %v3130_v24 }
 0x201   :  { %2665 = vmatprep.subr.bf16.mxu0 %v3131_v11  ;;  %2687 = vmatprep.subr.bf16.mxu1 %v3132_v25 }
 0x204   :  { %2666 = vmatpush3.bf16.msra.mxu0 %v3133_v26  ;;  %2688 = vmatpush3.bf16.msra.mxu1 %v3134_v27 }
 0x205   :  { %2667 = vmatprep.subr.bf16.mxu0 %v3135_v28  ;;  %2689 = vmatprep.subr.bf16.mxu1 %v3136_v13 }
 0x208   :  { %2668 = vmatpush3.bf16.msra.mxu0 %v3137_v29  ;;  %2690 = vmatpush3.bf16.msra.mxu1 %v3138_v30 }
 0x209   :  { %2669 = vmatprep.subr.bf16.mxu0 %v3139_v31  ;;  %2691 = vmatprep.subr.bf16.mxu1 %v3140_v20 }
 0x20c   :  { %2670 = vmatpush3.bf16.msra.mxu0 %v3141_v32  ;;  %2692 = vmatpush3.bf16.msra.mxu1 %v3142_v33 }
 0x2c2   :  { %v1890_v39 = vpop.f32.mrb[4].mxu0  ;;  %v1972_v40 = vpop.f32.mrb[4].mxu1 }
 0x2c3   :  { %v1892_v41 = vpop.f32.mrb[5].mxu0  ;;  %v1974_v42 = vpop.f32.mrb[5].mxu1 }
 0x2c4   :  { %v1979_v43 = vmax.f32 %v1890_v39, %v1892_v41  ;;  %v1980_v44 = vmax.f32 %v1972_v40, %v1974_v42  ;;  %v1894_v45 = vpop.f32.mrb[6].mxu0  ;;  %v1976_v46 = vpop.f32.mrb[6].mxu1 }
 0x2c5   :  { %v1895_v47 = vpop.f32.mrb[7].mxu0  ;;  %v1977_v48 = vpop.f32.mrb[7].mxu1  ;;  %v3164_v46 = vld [vmem:[#allocation2 + $0x10] sm:$0xff] }
 0x2c6   :  { %v1981_v49 = vmax.f32 %v1979_v43, %v1980_v44  ;;  %v3163_v44 = vld [vmem:[#allocation2] sm:$0xff] }
 0x2c8   :  { %1982 = vmax.xlane.f32.xlu0 %v1981_v49 }
 0x355   :  { %v1983_v2 = vpop.xlane.xlu0 %1982 }
 0x356   :  { %v1984_v3 = vsub.f32 %v1890_v39, %v1983_v2  ;;  %v1985_v4 = vsub.f32 %v1892_v41, %v1983_v2  ;;  %v1986_v5 = vsub.f32 %v1972_v40, %v1983_v2  ;;  %v1987_v6 = vsub.f32 %v1974_v42, %v1983_v2  ;;  %v3161_v40 = vld [vmem:[#allocation2 + $0x8] sm:$0xff]  ;;  %v3162_v42 = vld [vmem:[#allocation2 + $0x18] sm:$0xff] }
 0x358   :  { %v1988_v7 = vmul.f32 1.442695, %v1984_v3  ;;  %v1990_v8 = vmul.f32 1.442695, %v1985_v4  ;;  %v1992_v9 = vmul.f32 1.442695, %v1986_v5 }
 0x359   :  { %v1994_v10 = vmul.f32 1.442695, %v1987_v6 }
 0x35a   :  { %3151 = vpow2.f32 %v1988_v7 }
 0x35b   :  { %3153 = vpow2.f32 %v1990_v8 }
 0x35c   :  { %3155 = vpow2.f32 %v1992_v9 }
 0x35d   :  { %3157 = vpow2.f32 %v1994_v10 }
 0x364   :  { %v3152_v12 = vpop.eup %3151 }
 0x365   :  { %v3154_v14 = vpop.eup %3153 }
 0x366   :  { %v1996_v15 = vadd.f32 %v3154_v14, %v3152_v12  ;;  %v3156_v16 = vpop.eup %3155 }
 0x367   :  { %v3158_v18 = vpop.eup %3157 }
 0x368   :  { %v1997_v17 = vadd.f32 %v3156_v16, %v1996_v15 }
 0x36a   :  { %v1998_v19 = vadd.f32 %v3158_v18, %v1997_v17 }
 0x36c   :  { %1999 = vadd.xlane.f32.xlu0 %v1998_v19 }
 0x3f9   :  { %v2000_v34 = vpop.xlane.xlu0 %1999 }
 0x3fa   :  { %3159 = vrcp.f32 %v2000_v34 }
 0x404   :  { %v3160_v35 = vpop.eup %3159 }
 0x405   :  { %v2003_v36 = vmul.f32 %v3160_v35, %v3154_v14  ;;  %v2005_v37 = vmul.f32 %v3160_v35, %v3158_v18  ;;  %v2002_v38 = vmul.f32 %v3160_v35, %v3152_v12  ;;  %v2004_v39 = vmul.f32 %v3160_v35, %v3156_v16 }
 0x407   :  { %v2007_v41 = vmul.f32 %v3161_v40, %v2003_v36  ;;  %v2009_v43 = vmul.f32 %v3162_v42, %v2005_v37  ;;  %v2006_v45 = vmul.f32 %v3163_v44, %v2002_v38  ;;  %v2008_v47 = vmul.f32 %v3164_v46, %v2004_v39 }
 0x409   :  { %v2011_v48 = vpack.c.bf16 %v2007_v41, %v2007_v41  ;;  %v2013_v49 = vpack.c.bf16 %v2009_v43, %v2009_v43  ;;  %v2010_v50 = vpack.c.bf16 %v2006_v45, %v2006_v45  ;;  %v2012_v51 = vpack.c.bf16 %v2008_v47, %v2008_v47 }
 0x40b   :  { %2309 = vmatprep.mubr.bf16.mxu0 %v2011_v48  ;;  %2349 = vmatprep.mubr.bf16.mxu1 %v2013_v49 }
 0x40c   :  { %2310 = vmatmul.mubr.bf16.vlgmr.msra.gmra.mrb[8].mxu0 %v2010_v50  ;;  %2350 = vmatmul.mubr.bf16.vlgmr.msra.gmra.mrb[8].mxu1 %v2012_v51 }
 0x4df   :  { %v2671_v52 = vpop.f32.mrb[8].mxu0  ;;  %v2693_v53 = vpop.f32.mrb[8].mxu1 }
 0x4e0   :  { %v2672_v55 = vpop.f32.mrb[9].mxu0  ;;  %v2694_v56 = vpop.f32.mrb[9].mxu1 }
 0x4e1   :  { %v2673_v57 = vadd.f32 %v2672_v55, %v2671_v52  ;;  %v2695_v58 = vadd.f32 %v2694_v56, %v2693_v53  ;;  %v2674_v59 = vpop.f32.mrb[10].mxu0  ;;  %v2696_v60 = vpop.f32.mrb[10].mxu1 }
 0x4e2   :  { %v2675_v61 = vpop.f32.mrb[11].mxu0  ;;  %v2697_v62 = vpop.f32.mrb[11].mxu1 }
 0x4e3   :  { %v2312_v63 = vadd.f32 %v2673_v57, %v2622_v54 }
 0x4e5   :  { %v2352_v0 = vadd.f32 %v2695_v58, %v2312_v63 }
 0x4e7   :  { %2358 = vst.msk [vmem:[%s3386_s6] sm:$0xff] %vm2357_vm0, %v2352_v0 }
 0x4e8   :  { %2363 = vsyncpa [#allocation3], 1 }
 0x4e9   :  { %2364 = vsyncpa [#allocation5], 1 }
 0x4ea   :  { %2365 = vsyncpa [#allocation8], 1 }

</bundles_post_ra>
